<compile_context>
chip_gen: v7x
topology: tpu7x:2x2x1
jax: 0.10.0
libtpu: 0.0.40
codegen_flags: <defaults>
</compile_context>

<pallas_src>
import jax
import jax.numpy as jnp
from jax.experimental import pallas as pl
from jax.experimental.pallas import tpu as pltpu


NEG_SLOPE = 0.2   # RGATConv default negative_slope
EPS = 1e-16       # torch_geometric.utils.softmax denominator epsilon
NEG_INF = -1e30   # finite sentinel (avoids inf-inf NaNs in the online rescale)


def _round_up(x, m):
    return ((x + m - 1) // m) * m


def rgat_kernel(feat_ref, wxk_ref, wq_ref, expand_ref, compact_ref, bias_ref,
                src_ref, dst_ref, rel_ref,
                out_ref,
                tab_s, sq_s, m_s, den_s, acc_s):
    t = pl.program_id(0)
    nt = pl.num_programs(0)

    te = src_ref.shape[0]
    n = tab_s.shape[0]
    rd, dout = compact_ref.shape
    r = sq_s.shape[1]

    # ---- one-time init: per-node transform/score tables + accumulators ----------
    @pl.when(t == 0)
    def _init():
        feat = feat_ref[...]
        # tab[n] = [ feat[n] @ W_r (all r, wide) | (feat[n] @ W_r) @ k (all r) ]
        tab_s[...] = jnp.dot(feat, wxk_ref[...], preferred_element_type=jnp.float32)
        # sq[n, r] = (feat[n] @ W_r) @ q
        sq_s[...] = jnp.dot(feat, wq_ref[...], preferred_element_type=jnp.float32)
        m_s[...] = jnp.full_like(m_s, NEG_INF)
        den_s[...] = jnp.zeros_like(den_s)
        acc_s[...] = jnp.zeros_like(acc_s)

    # ---- build one-hots in-kernel from int32 index tiles (padded idx -> all-zero row)
    src = src_ref[...]                                             # [TE, 1]
    dst = dst_ref[...]                                             # [TE, 1]
    rel = rel_ref[...]                                             # [TE, 1]

    iota_n = jax.lax.broadcasted_iota(jnp.int32, (te, n), 1)
    src_oh = jnp.where(iota_n == src, 1.0, 0.0)                    # [TE, N] f32
    dst_match = iota_n == dst                                      # [TE, N] bool
    dst_oh = jnp.where(dst_match, 1.0, 0.0)                        # [TE, N] f32
    iota_r = jax.lax.broadcasted_iota(jnp.int32, (te, r), 1)
    rel_oh = jnp.where(iota_r == rel, 1.0, 0.0)                    # [TE, R] f32

    # ---- fused source gather: x2[src] (wide) and sk[src] in ONE matmul ----------
    gsrc = jnp.dot(src_oh, tab_s[...], preferred_element_type=jnp.float32)  # [TE, RD+R]
    g_wide = gsrc[:, :rd]                                          # [TE, RD]
    s_sk = gsrc[:, rd:]                                            # [TE, R]

    # destination attention-score gather
    d_sq = jnp.dot(dst_oh, sq_s[...], preferred_element_type=jnp.float32)   # [TE, R]

    qi = jnp.sum(d_sq * rel_oh, axis=1, keepdims=True)             # [TE, 1]
    kj = jnp.sum(s_sk * rel_oh, axis=1, keepdims=True)             # [TE, 1]
    a = qi + kj
    alpha = jnp.where(a >= 0, a, NEG_SLOPE * a)                    # leaky_relu, [TE, 1]

    # ---- online (flash-style) segment softmax over destinations -----------------
    masked = jnp.where(dst_match, alpha, NEG_INF)                  # [TE, N]
    tile_max = jnp.max(masked, axis=0, keepdims=True)              # [1, N]
    m_old = m_s[...]
    m_new = jnp.maximum(m_old, tile_max)                           # [1, N]
    m_s[...] = m_new
    scale = jnp.exp(m_old - m_new)                                 # [1, N]
    den_s[...] = den_s[...] * scale
    acc_s[...] = acc_s[...] * scale                                # broadcast over Dout rows

    # per-edge gather of the updated destination max
    max_e = jax.lax.dot_general(dst_oh, m_new, (((1,), (1,)), ((), ())),
                                preferred_element_type=jnp.float32)          # [TE, 1]
    exp_a = jnp.exp(alpha - max_e)                                 # [TE, 1]

    # ---- messages: relation-block select + compact (exp_a applied via the scatter)
    rel_sel = jnp.dot(rel_oh, expand_ref[...],
                      preferred_element_type=jnp.float32)          # [TE, RD]
    msg = jnp.dot(g_wide * rel_sel, compact_ref[...],
                  preferred_element_type=jnp.float32)              # [TE, Dout]

    # ---- fused den/acc scatter: weight the destination one-hot by exp_a ---------
    dst_w = dst_oh * exp_a                                         # [TE, N]
    den_s[...] += jnp.sum(dst_w, axis=0, keepdims=True)            # [1, N]
    acc_s[...] += jax.lax.dot_general(msg, dst_w, (((0,), (0,)), ((), ())),
                                      preferred_element_type=jnp.float32)    # [Dout, N]

    # ---- finalize ----------------------------------------------------------------
    @pl.when(t == nt - 1)
    def _finalize():
        out_t = acc_s[...] / (den_s[...] + EPS) + bias_ref[...]    # [Dout, N]
        out_ref[...] = jnp.maximum(out_t, 0.0).astype(out_ref.dtype)


def rgat_forward(edge_index, features, edge_type, weight, q, k, bias, *, tile_e=512):
    """RGAT_PyG.forward: relu(RGATConv(features, edge_index, edge_type))."""
    n, din = features.shape
    r, _, dout = weight.shape
    rd = r * dout
    e = edge_index.shape[1]

    # Edge tile size: multiple of 8 (f32/int32 sublane), capped by padded E.
    tile_e = int(_round_up(max(8, min(tile_e, _round_up(e, 8))), 8))
    e_pad = _round_up(e, tile_e)
    n_tiles = e_pad // tile_e
    pad = e_pad - e

    src = edge_index[0].astype(jnp.int32)
    dst = edge_index[1].astype(jnp.int32)
    rel = edge_type.astype(jnp.int32)
    if pad:
        # Pad with out-of-range indices -> all-zero in-kernel one-hot rows (no-op edges).
        src = jnp.concatenate([src, jnp.full((pad,), n, jnp.int32)])
        dst = jnp.concatenate([dst, jnp.full((pad,), n, jnp.int32)])
        rel = jnp.concatenate([rel, jnp.full((pad,), r, jnp.int32)])
    src2 = src.reshape(e_pad, 1)
    dst2 = dst.reshape(e_pad, 1)
    rel2 = rel.reshape(e_pad, 1)

    # Relation-blocked parameter layouts (pure layout prep, done once in XLA).
    weight = weight.astype(jnp.float32)
    w2 = jnp.transpose(weight, (1, 0, 2)).reshape(din, rd)                     # [Din, R*Dout]
    wk = jnp.squeeze(jnp.matmul(weight, k.astype(jnp.float32)), -1).T          # [Din, R]
    wq = jnp.squeeze(jnp.matmul(weight, q.astype(jnp.float32)), -1).T          # [Din, R]
    wxk = jnp.concatenate([w2, wk], axis=1)                                    # [Din, RD+R]
    expand = jnp.repeat(jnp.eye(r, dtype=jnp.float32), dout, axis=1)           # [R, RD]
    compact = jnp.tile(jnp.eye(dout, dtype=jnp.float32), (r, 1))               # [RD, Dout]
    bias_col = bias.reshape(dout, 1).astype(jnp.float32)                       # [Dout, 1]

    def const_spec(shape):
        return pl.BlockSpec(shape, lambda t: (0, 0))

    def edge_spec():
        return pl.BlockSpec((tile_e, 1), lambda t: (t, 0))

    # Cost estimate (advisory).
    flops = 2 * (n * din * (rd + 2 * r)          # one-time node transform / score tables
                 + e_pad * n * (rd + r)          # fused source gather
                 + e_pad * n * r                 # destination score gather
                 + e_pad * n                     # per-edge max gather
                 + e_pad * r * rd                # rel_sel expand
                 + e_pad * rd * dout             # relation compaction
                 + e_pad * n * dout)             # message scatter
    trans = 2 * e_pad + n_tiles * n
    bytes_accessed = 4 * (features.size + wxk.size + wq.size + expand.size
                          + compact.size + bias_col.size
                          + 3 * e_pad + dout * n)

    # VMEM budget (double-buffered inputs + resident scratch), clamped so it also
    # fits v7x's 64 MiB physical VMEM.
    f32b = 4
    const_bytes = f32b * (n * din + din * (rd + r) + din * r + r * rd + rd * dout + dout)
    edge_bytes = 4 * 3 * tile_e
    scratch_bytes = f32b * (n * (rd + r) + n * r + 2 * n + dout * n)
    out_bytes = f32b * dout * n
    interm_bytes = 8 * f32b * tile_e * max(rd + r, n)   # headroom for spilled intermediates
    vmem_need = 2 * (const_bytes + edge_bytes) + scratch_bytes + 2 * out_bytes + interm_bytes
    vmem_limit = int(min(48 * 1024 * 1024, max(16 * 1024 * 1024, 4 * vmem_need)))

    out_t = pl.pallas_call(
        rgat_kernel,
        out_shape=jax.ShapeDtypeStruct((dout, n), jnp.float32),
        grid_spec=pltpu.PrefetchScalarGridSpec(
            num_scalar_prefetch=0,
            grid=(n_tiles,),                      # single pass over edge tiles
            in_specs=[
                const_spec((n, din)),             # feat
                const_spec((din, rd + r)),        # wxk = [W (wide) | W @ k]
                const_spec((din, r)),             # wq  = W @ q
                const_spec((r, rd)),              # expand (relation -> block selector)
                const_spec((rd, dout)),           # compact (block -> Dout)
                const_spec((dout, 1)),            # bias (column)
                edge_spec(),                      # src indices  [tile_e, 1] int32
                edge_spec(),                      # dst indices
                edge_spec(),                      # rel indices
            ],
            out_specs=pl.BlockSpec((dout, n), lambda t: (0, 0)),
            scratch_shapes=[
                pltpu.VMEM((n, rd + r), jnp.float32),   # tab_s: [x2 | sk] per node
                pltpu.VMEM((n, r), jnp.float32),        # sq_s
                pltpu.VMEM((1, n), jnp.float32),        # m_s:   running per-node max
                pltpu.VMEM((1, n), jnp.float32),        # den_s: softmax denominator
                pltpu.VMEM((dout, n), jnp.float32),     # acc_s: aggregated output^T
            ]),
        compiler_params=pltpu.CompilerParams(
            # Sequential edge axis: shared online-softmax accumulators.
            dimension_semantics=("arbitrary",),
            vmem_limit_bytes=vmem_limit),
        cost_estimate=pl.CostEstimate(
            flops=int(flops),
            transcendentals=int(trans),
            bytes_accessed=int(bytes_accessed)),
    )(features.astype(jnp.float32), wxk, wq, expand, compact, bias_col,
      src2, dst2, rel2)

    return out_t.T   # [Dout, N] (lane-dense in-kernel) -> [N, Dout]


def rgat_reference(edge_index, features, edge_type, weight, q, k, bias):
    """Pure-JAX edge-list reference (mirrors PyG RGATConv defaults)."""
    n = features.shape[0]
    src, dst = edge_index[0], edge_index[1]
    w_e = weight[edge_type]                                 # [E, Din, Dout]
    out_i = jnp.einsum('ed,edo->eo', features[dst], w_e)    # [E, Dout]
    out_j = jnp.einsum('ed,edo->eo', features[src], w_e)    # [E, Dout]
    a = out_i @ q + out_j @ k                               # [E, 1]
    alpha = jnp.where(a >= 0, a, NEG_SLOPE * a)
    seg_max = jax.ops.segment_max(alpha, dst, num_segments=n)
    alpha = jnp.exp(alpha - seg_max[dst])
    denom = jax.ops.segment_sum(alpha, dst, num_segments=n) + EPS
    alpha = alpha / denom[dst]
    msg = alpha * out_j
    agg = jax.ops.segment_sum(msg, dst, num_segments=n)
    return jnp.maximum(agg + bias[None, :], 0.0)


if __name__ == "__main__":
    N, IN_DIM, OUT_DIM, NUM_RELS, E = 16, 32, 32, 4, 64

    key = jax.random.PRNGKey(0)
    k1, k2, k3, k4, k5, k6, k7 = jax.random.split(key, 7)

    # Deterministic synthetic graph.
    src = jax.random.randint(k1, (E,), 0, N, dtype=jnp.int32)
    dst = jax.random.randint(k2, (E,), 0, N, dtype=jnp.int32)
    edge_index = jnp.stack([src, dst], axis=0)              # [2, E]
    edge_type = jax.random.randint(k3, (E,), 0, NUM_RELS, dtype=jnp.int32)
    features = jax.random.normal(k4, (N, IN_DIM), dtype=jnp.float32)

    # Deterministic parameters (glorot-style uniform; PyG inits bias to zero).
    def glorot(rng, shape):
        fan_in, fan_out = shape[-2], shape[-1]
        lim = (6.0 / (fan_in + fan_out)) ** 0.5
        return jax.random.uniform(rng, shape, jnp.float32, -lim, lim)

    weight = glorot(k5, (NUM_RELS, IN_DIM, OUT_DIM))          # RGATConv.weight
    q = glorot(k6, (OUT_DIM, 1))                              # RGATConv.q (heads*dim = 1)
    k_att = glorot(k7, (OUT_DIM, 1))                          # RGATConv.k
    bias = jnp.zeros((OUT_DIM,), jnp.float32)                 # RGATConv.bias

    out = rgat_forward(edge_index, features, edge_type, weight, q, k_att, bias)
    out = jax.block_until_ready(out)

    ref = rgat_reference(edge_index, features, edge_type, weight, q, k_att, bias)
    assert out.shape == (N, OUT_DIM)
    assert jnp.allclose(out, ref, rtol=1e-4, atol=1e-4), "mismatch vs JAX reference"

    print("KERNEL_OK")
</pallas_src>

<mosaic_0001>
module attributes {stable_mosaic.version = 11 : i64} {
  func.func @rgat_kernel(%arg0: i32, %arg1: memref<16x32xf32, #tpu.memory_space<vmem>>, %arg2: memref<32x132xf32, #tpu.memory_space<vmem>>, %arg3: memref<32x4xf32, #tpu.memory_space<vmem>>, %arg4: memref<4x128xf32, #tpu.memory_space<vmem>>, %arg5: memref<128x32xf32, #tpu.memory_space<vmem>>, %arg6: memref<32x1xf32, #tpu.memory_space<vmem>>, %arg7: memref<64x1xi32, #tpu.memory_space<vmem>>, %arg8: memref<64x1xi32, #tpu.memory_space<vmem>>, %arg9: memref<64x1xi32, #tpu.memory_space<vmem>>, %arg10: memref<32x16xf32, #tpu.memory_space<vmem>>, %arg11: memref<16x132xf32, #tpu.memory_space<vmem>>, %arg12: memref<16x4xf32, #tpu.memory_space<vmem>>, %arg13: memref<1x16xf32, #tpu.memory_space<vmem>>, %arg14: memref<1x16xf32, #tpu.memory_space<vmem>>, %arg15: memref<32x16xf32, #tpu.memory_space<vmem>>) attributes {dimension_semantics = [#tpu.dimension_semantics<arbitrary>], iteration_bounds = array<i64: 1>, scalar_prefetch = 0 : i64, scratch_operands = 5 : i64, tpu.core_type = #tpu.core_type<tc>, window_params = [{pipeline_mode = #tpu.pipeline_mode<synchronous>, transform_indices = @transform_0, window_bounds = array<i64: 16, 32>}, {pipeline_mode = #tpu.pipeline_mode<synchronous>, transform_indices = @transform_1, window_bounds = array<i64: 32, 132>}, {pipeline_mode = #tpu.pipeline_mode<synchronous>, transform_indices = @transform_2, window_bounds = array<i64: 32, 4>}, {pipeline_mode = #tpu.pipeline_mode<synchronous>, transform_indices = @transform_3, window_bounds = array<i64: 4, 128>}, {pipeline_mode = #tpu.pipeline_mode<synchronous>, transform_indices = @transform_4, window_bounds = array<i64: 128, 32>}, {pipeline_mode = #tpu.pipeline_mode<synchronous>, transform_indices = @transform_5, window_bounds = array<i64: 32, 1>}, {transform_indices = @transform_6, window_bounds = array<i64: 64, 1>}, {transform_indices = @transform_7, window_bounds = array<i64: 64, 1>}, {transform_indices = @transform_8, window_bounds = array<i64: 64, 1>}, {pipeline_mode = #tpu.pipeline_mode<synchronous>, transform_indices = @transform_9, window_bounds = array<i64: 32, 16>}]} {
    %c0_i32 = arith.constant 0 : i32
    %0 = arith.cmpi eq, %arg0, %c0_i32 : i32
    %1 = arith.extui %0 : i1 to i32
    %c0_i32_0 = arith.constant 0 : i32
    %2 = arith.cmpi ne, %1, %c0_i32_0 : i32
    scf.if %2 {
      %c0_54 = arith.constant 0 : index
      %c0_55 = arith.constant 0 : index
      %81 = vector.load %arg1[%c0_54, %c0_55] : memref<16x32xf32, #tpu.memory_space<vmem>>, vector<16x32xf32>
      %c0_56 = arith.constant 0 : index
      %c0_57 = arith.constant 0 : index
      %82 = vector.load %arg2[%c0_56, %c0_57] : memref<32x132xf32, #tpu.memory_space<vmem>>, vector<32x132xf32>
      %cst_58 = arith.constant dense<0.000000e+00> : vector<16x132xf32>
      %83 = tpu.matmul %81, %82, %cst_58 {dimension_numbers = #tpu.dot_dimension_numbers<[1], [0], [0], [1], [0, 0, 1, 1], [], []>} : vector<16x32xf32>, vector<32x132xf32>, vector<16x132xf32> -> vector<16x132xf32>
      %c0_59 = arith.constant 0 : index
      %c0_60 = arith.constant 0 : index
      %84 = vector.load %arg11[%c0_59, %c0_60] : memref<16x132xf32, #tpu.memory_space<vmem>>, vector<16x132xf32>
      tpu.vector_store %arg11[%c0_59, %c0_60], %83 {strides = array<i32>} : memref<16x132xf32, #tpu.memory_space<vmem>>, vector<16x132xf32>,
      %c0_61 = arith.constant 0 : index
      %c0_62 = arith.constant 0 : index
      %85 = vector.load %arg3[%c0_61, %c0_62] : memref<32x4xf32, #tpu.memory_space<vmem>>, vector<32x4xf32>
      %cst_63 = arith.constant dense<0.000000e+00> : vector<16x4xf32>
      %86 = tpu.matmul %81, %85, %cst_63 {dimension_numbers = #tpu.dot_dimension_numbers<[1], [0], [0], [1], [0, 0, 1, 1], [], []>} : vector<16x32xf32>, vector<32x4xf32>, vector<16x4xf32> -> vector<16x4xf32>
      %c0_64 = arith.constant 0 : index
      %c0_65 = arith.constant 0 : index
      %87 = vector.load %arg12[%c0_64, %c0_65] : memref<16x4xf32, #tpu.memory_space<vmem>>, vector<16x4xf32>
      tpu.vector_store %arg12[%c0_64, %c0_65], %86 {strides = array<i32>} : memref<16x4xf32, #tpu.memory_space<vmem>>, vector<16x4xf32>,
      %cst_66 = arith.constant -1.000000e+30 : f32
      %88 = vector.broadcast %cst_66 : f32 to vector<1x16xf32>
      %c0_67 = arith.constant 0 : index
      %c0_68 = arith.constant 0 : index
      %89 = vector.load %arg13[%c0_67, %c0_68] : memref<1x16xf32, #tpu.memory_space<vmem>>, vector<1x16xf32>
      tpu.vector_store %arg13[%c0_67, %c0_68], %88 {strides = array<i32>} : memref<1x16xf32, #tpu.memory_space<vmem>>, vector<1x16xf32>,
      %cst_69 = arith.constant 0.000000e+00 : f32
      %90 = vector.broadcast %cst_69 : f32 to vector<1x16xf32>
      %c0_70 = arith.constant 0 : index
      %c0_71 = arith.constant 0 : index
      %91 = vector.load %arg14[%c0_70, %c0_71] : memref<1x16xf32, #tpu.memory_space<vmem>>, vector<1x16xf32>
      tpu.vector_store %arg14[%c0_70, %c0_71], %90 {strides = array<i32>} : memref<1x16xf32, #tpu.memory_space<vmem>>, vector<1x16xf32>,
      %cst_72 = arith.constant 0.000000e+00 : f32
      %92 = vector.broadcast %cst_72 : f32 to vector<32x16xf32>
      %c0_73 = arith.constant 0 : index
      %c0_74 = arith.constant 0 : index
      %93 = vector.load %arg15[%c0_73, %c0_74] : memref<32x16xf32, #tpu.memory_space<vmem>>, vector<32x16xf32>
      tpu.vector_store %arg15[%c0_73, %c0_74], %92 {strides = array<i32>} : memref<32x16xf32, #tpu.memory_space<vmem>>, vector<32x16xf32>,
    } else {
    }
    %c0 = arith.constant 0 : index
    %c0_1 = arith.constant 0 : index
    %3 = vector.load %arg7[%c0, %c0_1] : memref<64x1xi32, #tpu.memory_space<vmem>>, vector<64x1xi32>
    %c0_2 = arith.constant 0 : index
    %c0_3 = arith.constant 0 : index
    %4 = vector.load %arg8[%c0_2, %c0_3] : memref<64x1xi32, #tpu.memory_space<vmem>>, vector<64x1xi32>
    %c0_4 = arith.constant 0 : index
    %c0_5 = arith.constant 0 : index
    %5 = vector.load %arg9[%c0_4, %c0_5] : memref<64x1xi32, #tpu.memory_space<vmem>>, vector<64x1xi32>
    %6 = tpu.iota {dimensions = array<i32: 1>} : vector<64x16xi32>
    %7 = vector.broadcast %3 : vector<64x1xi32> to vector<64x16xi32>
    %8 = arith.cmpi eq, %6, %7 : vector<64x16xi32>
    %cst = arith.constant 1.000000e+00 : f32
    %cst_6 = arith.constant 0.000000e+00 : f32
    %9 = vector.broadcast %cst : f32 to vector<64x16xf32>
    %10 = vector.broadcast %cst_6 : f32 to vector<64x16xf32>
    %11 = arith.select %8, %9, %10 : vector<64x16xi1>, vector<64x16xf32>
    %12 = vector.broadcast %4 : vector<64x1xi32> to vector<64x16xi32>
    %13 = arith.cmpi eq, %6, %12 : vector<64x16xi32>
    %cst_7 = arith.constant 1.000000e+00 : f32
    %cst_8 = arith.constant 0.000000e+00 : f32
    %14 = vector.broadcast %cst_7 : f32 to vector<64x16xf32>
    %15 = vector.broadcast %cst_8 : f32 to vector<64x16xf32>
    %16 = arith.select %13, %14, %15 : vector<64x16xi1>, vector<64x16xf32>
    %17 = tpu.iota {dimensions = array<i32: 1>} : vector<64x4xi32>
    %18 = vector.broadcast %5 : vector<64x1xi32> to vector<64x4xi32>
    %19 = arith.cmpi eq, %17, %18 : vector<64x4xi32>
    %cst_9 = arith.constant 1.000000e+00 : f32
    %cst_10 = arith.constant 0.000000e+00 : f32
    %20 = vector.broadcast %cst_9 : f32 to vector<64x4xf32>
    %21 = vector.broadcast %cst_10 : f32 to vector<64x4xf32>
    %22 = arith.select %19, %20, %21 : vector<64x4xi1>, vector<64x4xf32>
    %c0_11 = arith.constant 0 : index
    %c0_12 = arith.constant 0 : index
    %23 = vector.load %arg11[%c0_11, %c0_12] : memref<16x132xf32, #tpu.memory_space<vmem>>, vector<16x132xf32>
    %cst_13 = arith.constant dense<0.000000e+00> : vector<64x132xf32>
    %24 = tpu.matmul %11, %23, %cst_13 {dimension_numbers = #tpu.dot_dimension_numbers<[1], [0], [0], [1], [0, 0, 1, 1], [], []>} : vector<64x16xf32>, vector<16x132xf32>, vector<64x132xf32> -> vector<64x132xf32>
    %25 = vector.extract_strided_slice %24 {offsets = [0, 0], sizes = [64, 128], strides = [1, 1]} : vector<64x132xf32> to vector<64x128xf32>
    %26 = vector.extract_strided_slice %24 {offsets = [0, 128], sizes = [64, 4], strides = [1, 1]} : vector<64x132xf32> to vector<64x4xf32>
    %c0_14 = arith.constant 0 : index
    %c0_15 = arith.constant 0 : index
    %27 = vector.load %arg12[%c0_14, %c0_15] : memref<16x4xf32, #tpu.memory_space<vmem>>, vector<16x4xf32>
    %cst_16 = arith.constant dense<0.000000e+00> : vector<64x4xf32>
    %28 = tpu.matmul %16, %27, %cst_16 {dimension_numbers = #tpu.dot_dimension_numbers<[1], [0], [0], [1], [0, 0, 1, 1], [], []>} : vector<64x16xf32>, vector<16x4xf32>, vector<64x4xf32> -> vector<64x4xf32>
    %29 = arith.mulf %28, %22 : vector<64x4xf32>
    %cst_17 = arith.constant dense<0.000000e+00> : vector<64xf32>
    %30 = vector.multi_reduction <add>, %29, %cst_17 [1] : vector<64x4xf32> to vector<64xf32>
    %31 = vector.shape_cast %30 : vector<64xf32> to vector<64x1xf32>
    %32 = arith.mulf %26, %22 : vector<64x4xf32>
    %cst_18 = arith.constant dense<0.000000e+00> : vector<64xf32>
    %33 = vector.multi_reduction <add>, %32, %cst_18 [1] : vector<64x4xf32> to vector<64xf32>
    %34 = vector.shape_cast %33 : vector<64xf32> to vector<64x1xf32>
    %35 = arith.addf %31, %34 : vector<64x1xf32>
    %cst_19 = arith.constant 0.000000e+00 : f32
    %36 = vector.broadcast %cst_19 : f32 to vector<64x1xf32>
    %37 = arith.cmpf oge, %35, %36 : vector<64x1xf32>
    %cst_20 = arith.constant 2.000000e-01 : f32
    %38 = vector.broadcast %cst_20 : f32 to vector<64x1xf32>
    %39 = arith.mulf %38, %35 : vector<64x1xf32>
    %40 = arith.select %37, %35, %39 : vector<64x1xi1>, vector<64x1xf32>
    %cst_21 = arith.constant -1.000000e+30 : f32
    %41 = vector.shape_cast %40 : vector<64x1xf32> to vector<64x1xf32>
    %42 = vector.broadcast %41 : vector<64x1xf32> to vector<64x16xf32>
    %43 = vector.broadcast %cst_21 : f32 to vector<64x16xf32>
    %44 = arith.select %13, %42, %43 : vector<64x16xi1>, vector<64x16xf32>
    %cst_22 = arith.constant dense<0xFF800000> : vector<16xf32>
    %45 = vector.multi_reduction <maximumf>, %44, %cst_22 [0] : vector<64x16xf32> to vector<16xf32>
    %46 = vector.shape_cast %45 : vector<16xf32> to vector<1x16xf32>
    %c0_23 = arith.constant 0 : index
    %c0_24 = arith.constant 0 : index
    %47 = vector.load %arg13[%c0_23, %c0_24] : memref<1x16xf32, #tpu.memory_space<vmem>>, vector<1x16xf32>
    %48 = arith.maximumf %47, %46 : vector<1x16xf32>
    %c0_25 = arith.constant 0 : index
    %c0_26 = arith.constant 0 : index
    %49 = vector.load %arg13[%c0_25, %c0_26] : memref<1x16xf32, #tpu.memory_space<vmem>>, vector<1x16xf32>
    tpu.vector_store %arg13[%c0_25, %c0_26], %48 {strides = array<i32>} : memref<1x16xf32, #tpu.memory_space<vmem>>, vector<1x16xf32>,
    %50 = arith.subf %47, %48 : vector<1x16xf32>
    %51 = math.exp %50 : vector<1x16xf32>
    %c0_27 = arith.constant 0 : index
    %c0_28 = arith.constant 0 : index
    %52 = vector.load %arg14[%c0_27, %c0_28] : memref<1x16xf32, #tpu.memory_space<vmem>>, vector<1x16xf32>
    %53 = arith.mulf %52, %51 : vector<1x16xf32>
    %c0_29 = arith.constant 0 : index
    %c0_30 = arith.constant 0 : index
    %54 = vector.load %arg14[%c0_29, %c0_30] : memref<1x16xf32, #tpu.memory_space<vmem>>, vector<1x16xf32>
    tpu.vector_store %arg14[%c0_29, %c0_30], %53 {strides = array<i32>} : memref<1x16xf32, #tpu.memory_space<vmem>>, vector<1x16xf32>,
    %c0_31 = arith.constant 0 : index
    %c0_32 = arith.constant 0 : index
    %55 = vector.load %arg15[%c0_31, %c0_32] : memref<32x16xf32, #tpu.memory_space<vmem>>, vector<32x16xf32>
    %56 = vector.broadcast %51 : vector<1x16xf32> to vector<32x16xf32>
    %57 = arith.mulf %55, %56 : vector<32x16xf32>
    %c0_33 = arith.constant 0 : index
    %c0_34 = arith.constant 0 : index
    %58 = vector.load %arg15[%c0_33, %c0_34] : memref<32x16xf32, #tpu.memory_space<vmem>>, vector<32x16xf32>
    tpu.vector_store %arg15[%c0_33, %c0_34], %57 {strides = array<i32>} : memref<32x16xf32, #tpu.memory_space<vmem>>, vector<32x16xf32>,
    %cst_35 = arith.constant dense<0.000000e+00> : vector<64x1xf32>
    %59 = tpu.matmul %16, %48, %cst_35 {dimension_numbers = #tpu.dot_dimension_numbers<[1], [1], [0], [0], [0, 0, 1, 0], [], []>} : vector<64x16xf32>, vector<1x16xf32>, vector<64x1xf32> -> vector<64x1xf32>
    %60 = arith.subf %40, %59 : vector<64x1xf32>
    %61 = math.exp %60 : vector<64x1xf32>
    %c0_36 = arith.constant 0 : index
    %c0_37 = arith.constant 0 : index
    %62 = vector.load %arg4[%c0_36, %c0_37] : memref<4x128xf32, #tpu.memory_space<vmem>>, vector<4x128xf32>
    %cst_38 = arith.constant dense<0.000000e+00> : vector<64x128xf32>
    %63 = tpu.matmul %22, %62, %cst_38 {dimension_numbers = #tpu.dot_dimension_numbers<[1], [0], [0], [1], [0, 0, 1, 1], [], []>} : vector<64x4xf32>, vector<4x128xf32>, vector<64x128xf32> -> vector<64x128xf32>
    %64 = arith.mulf %25, %63 : vector<64x128xf32>
    %c0_39 = arith.constant 0 : index
    %c0_40 = arith.constant 0 : index
    %65 = vector.load %arg5[%c0_39, %c0_40] : memref<128x32xf32, #tpu.memory_space<vmem>>, vector<128x32xf32>
    %cst_41 = arith.constant dense<0.000000e+00> : vector<64x32xf32>
    %66 = tpu.matmul %64, %65, %cst_41 {dimension_numbers = #tpu.dot_dimension_numbers<[1], [0], [0], [1], [0, 0, 1, 1], [], []>} : vector<64x128xf32>, vector<128x32xf32>, vector<64x32xf32> -> vector<64x32xf32>
    %67 = vector.broadcast %61 : vector<64x1xf32> to vector<64x16xf32>
    %68 = arith.mulf %16, %67 : vector<64x16xf32>
    %c0_42 = arith.constant 0 : index
    %c0_43 = arith.constant 0 : index
    %69 = vector.load %arg14[%c0_42, %c0_43] : memref<1x16xf32, #tpu.memory_space<vmem>>, vector<1x16xf32>
    %cst_44 = arith.constant dense<0.000000e+00> : vector<16xf32>
    %70 = vector.multi_reduction <add>, %68, %cst_44 [0] : vector<64x16xf32> to vector<16xf32>
    %71 = vector.shape_cast %70 : vector<16xf32> to vector<1x16xf32>
    %72 = arith.addf %69, %71 : vector<1x16xf32>
    %c0_45 = arith.constant 0 : index
    %c0_46 = arith.constant 0 : index
    %73 = vector.load %arg14[%c0_45, %c0_46] : memref<1x16xf32, #tpu.memory_space<vmem>>, vector<1x16xf32>
    tpu.vector_store %arg14[%c0_45, %c0_46], %72 {strides = array<i32>} : memref<1x16xf32, #tpu.memory_space<vmem>>, vector<1x16xf32>,
    %c0_47 = arith.constant 0 : index
    %c0_48 = arith.constant 0 : index
    %74 = vector.load %arg15[%c0_47, %c0_48] : memref<32x16xf32, #tpu.memory_space<vmem>>, vector<32x16xf32>
    %cst_49 = arith.constant dense<0.000000e+00> : vector<32x16xf32>
    %75 = tpu.matmul %66, %68, %cst_49 {dimension_numbers = #tpu.dot_dimension_numbers<[0], [0], [1], [1], [0, 1, 1, 1], [], []>} : vector<64x32xf32>, vector<64x16xf32>, vector<32x16xf32> -> vector<32x16xf32>
    %76 = arith.addf %74, %75 : vector<32x16xf32>
    %c0_50 = arith.constant 0 : index
    %c0_51 = arith.constant 0 : index
    %77 = vector.load %arg15[%c0_50, %c0_51] : memref<32x16xf32, #tpu.memory_space<vmem>>, vector<32x16xf32>
    tpu.vector_store %arg15[%c0_50, %c0_51], %76 {strides = array<i32>} : memref<32x16xf32, #tpu.memory_space<vmem>>, vector<32x16xf32>,
    %c0_i32_52 = arith.constant 0 : i32
    %78 = arith.cmpi eq, %arg0, %c0_i32_52 : i32
    %79 = arith.extui %78 : i1 to i32
    %c0_i32_53 = arith.constant 0 : i32
    %80 = arith.cmpi ne, %79, %c0_i32_53 : i32
    scf.if %80 {
      %c0_54 = arith.constant 0 : index
      %c0_55 = arith.constant 0 : index
      %81 = vector.load %arg15[%c0_54, %c0_55] : memref<32x16xf32, #tpu.memory_space<vmem>>, vector<32x16xf32>
      %c0_56 = arith.constant 0 : index
      %c0_57 = arith.constant 0 : index
      %82 = vector.load %arg14[%c0_56, %c0_57] : memref<1x16xf32, #tpu.memory_space<vmem>>, vector<1x16xf32>
      %cst_58 = arith.constant 1.000000e-16 : f32
      %83 = vector.broadcast %cst_58 : f32 to vector<1x16xf32>
      %84 = arith.addf %82, %83 : vector<1x16xf32>
      %85 = vector.broadcast %84 : vector<1x16xf32> to vector<32x16xf32>
      %86 = arith.divf %81, %85 : vector<32x16xf32>
      %c0_59 = arith.constant 0 : index
      %c0_60 = arith.constant 0 : index
      %87 = vector.load %arg6[%c0_59, %c0_60] : memref<32x1xf32, #tpu.memory_space<vmem>>, vector<32x1xf32>
      %88 = vector.broadcast %87 : vector<32x1xf32> to vector<32x16xf32>
      %89 = arith.addf %86, %88 : vector<32x16xf32>
      %cst_61 = arith.constant 0.000000e+00 : f32
      %90 = vector.broadcast %cst_61 : f32 to vector<32x16xf32>
      %91 = arith.maximumf %89, %90 : vector<32x16xf32>
      %c0_62 = arith.constant 0 : index
      %c0_63 = arith.constant 0 : index
      %92 = vector.load %arg10[%c0_62, %c0_63] : memref<32x16xf32, #tpu.memory_space<vmem>>, vector<32x16xf32>
      tpu.vector_store %arg10[%c0_62, %c0_63], %91 {strides = array<i32>} : memref<32x16xf32, #tpu.memory_space<vmem>>, vector<32x16xf32>,
    } else {
    }
    return
  }
  func.func @transform_0(%arg0: i32) -> (i32, i32) {
    %c0_i32 = arith.constant 0 : i32
    %c0_i32_0 = arith.constant 0 : i32
    %c0_i32_1 = arith.constant 0 : i32
    return %c0_i32, %c0_i32_0 : i32, i32
  }
  func.func @transform_1(%arg0: i32) -> (i32, i32) {
    %c0_i32 = arith.constant 0 : i32
    %c0_i32_0 = arith.constant 0 : i32
    %c0_i32_1 = arith.constant 0 : i32
    return %c0_i32, %c0_i32_0 : i32, i32
  }
  func.func @transform_2(%arg0: i32) -> (i32, i32) {
    %c0_i32 = arith.constant 0 : i32
    %c0_i32_0 = arith.constant 0 : i32
    %c0_i32_1 = arith.constant 0 : i32
    return %c0_i32, %c0_i32_0 : i32, i32
  }
  func.func @transform_3(%arg0: i32) -> (i32, i32) {
    %c0_i32 = arith.constant 0 : i32
    %c0_i32_0 = arith.constant 0 : i32
    %c0_i32_1 = arith.constant 0 : i32
    return %c0_i32, %c0_i32_0 : i32, i32
  }
  func.func @transform_4(%arg0: i32) -> (i32, i32) {
    %c0_i32 = arith.constant 0 : i32
    %c0_i32_0 = arith.constant 0 : i32
    %c0_i32_1 = arith.constant 0 : i32
    return %c0_i32, %c0_i32_0 : i32, i32
  }
  func.func @transform_5(%arg0: i32) -> (i32, i32) {
    %c0_i32 = arith.constant 0 : i32
    %c0_i32_0 = arith.constant 0 : i32
    %c0_i32_1 = arith.constant 0 : i32
    return %c0_i32, %c0_i32_0 : i32, i32
  }
  func.func @transform_6(%arg0: i32) -> (i32, i32) {
    %c0_i32 = arith.constant 0 : i32
    %c0_i32_0 = arith.constant 0 : i32
    return %arg0, %c0_i32 : i32, i32
  }
  func.func @transform_7(%arg0: i32) -> (i32, i32) {
    %c0_i32 = arith.constant 0 : i32
    %c0_i32_0 = arith.constant 0 : i32
    return %arg0, %c0_i32 : i32, i32
  }
  func.func @transform_8(%arg0: i32) -> (i32, i32) {
    %c0_i32 = arith.constant 0 : i32
    %c0_i32_0 = arith.constant 0 : i32
    return %arg0, %c0_i32 : i32, i32
  }
  func.func @transform_9(%arg0: i32) -> (i32, i32) {
    %c0_i32 = arith.constant 0 : i32
    %c0_i32_0 = arith.constant 0 : i32
    %c0_i32_1 = arith.constant 0 : i32
    return %c0_i32, %c0_i32_0 : i32, i32
  }
}

</mosaic_0001>

<bundles_post_ra>
// kernel: tpu_custom_call.1
= control target key start
LH: loop header
LB: loop body
LE: loop exit
PB: predicated region body
PF: predicated region fallthrough
CT: control target
= control target key end

     0   :  { %v1654_v3 = vmov 0.0   ;;  %v1655_v4 = vmov 0   ;;  %vm46_vm0 = vcmask 261120   ;;  %vm219_vm1 = vcmask 130048   ;;  %s2266_s1 = inlined_call_operand.vmem [shape: f32[32,132], index: 1, kind: input, shape index: {}]   ;;  %s2267_s2 = inlined_call_operand.vmem [shape: f32[32,4], index: 2, kind: input, shape index: {}]   ;;  %s2268_s0 = inlined_call_operand.vmem [shape: f32[16,32], index: 0, kind: input, shape index: {}]   ;;  %s2269_s7 = inlined_call_operand.vmem [shape: s32[64,1], index: 7, kind: input, shape index: {}]   ;;  %s2270_s6 = inlined_call_operand.vmem [shape: s32[64,1], index: 6, kind: input, shape index: {}]   ;;  %s2271_s8 = inlined_call_operand.vmem [shape: s32[64,1], index: 8, kind: input, shape index: {}]   ;;  %s2272_s3 = inlined_call_operand.vmem [shape: f32[4,128], index: 3, kind: input, shape index: {}]   ;;  %s2273_s4 = inlined_call_operand.vmem [shape: f32[128,32], index: 4, kind: input, shape index: {}]   ;;  %s2274_s5 = inlined_call_operand.vmem [shape: f32[32,1], index: 5, kind: input, shape index: {}]   ;;  %s2275_s9 = inlined_call_operand.vmem [shape: f32[32,16], index: 9, kind: output, shape index: {}]  }
   0x1   :  { %v39_v0 = vld [vmem:[%s2266_s1 + $0x8] sm:$0xff]  ;;  %v41_v1 = vld [vmem:[%s2266_s1 + $0x18] sm:$0xff]  ;;  %v135_v2 = vld [vmem:[%s2267_s2] sm:$0xff]  ;;  %117 = vmatprep.mubr.f32.mxu0 %v1654_v3  ;;  %1633 = vset.pattern.permute.xlu1 %v1655_v4  ;;  %220 = vst.msk [vmem:[#allocation6] sm:$0xff] %vm219_vm1, %v1654_v3  ;;  %v248_v46 = vlaneseq  ;;  %vm131_vm3 = vcmask 31744   ;;  %vm884_vm4 = vcmask 1043456  }
   0x2   :  { %v1557_v5 = vpack.c.bf16 %v41_v1, %v39_v0  ;;  %v136_v6 = vld [vmem:[%s2267_s2 + $0x8] sm:$0xff]  ;;  %v38_v7 = vld [vmem:[%s2266_s1] sm:$0xff]  ;;  %v40_v8 = vld [vmem:[%s2266_s1 + $0x10] sm:$0xff]  ;;  %1632 = vset.pattern.permute.xlu0 %v1655_v4  ;;  %221 = vst.msk [vmem:[#allocation6 + $0x8] sm:$0xff] %vm219_vm1, %v1654_v3 }
   0x3   :  { %v1565_v9 = vpack.c.bf16 %v136_v6, %v135_v2  ;;  %v1559_v10 = vpack.c.bf16 %v40_v8, %v38_v7  ;;  %v43_v11 = vld [vmem:[%s2266_s1 + $0x28] sm:$0xff]  ;;  %v45_v12 = vld [vmem:[%s2266_s1 + $0x38] sm:$0xff]  ;;  %v137_v13 = vld [vmem:[%s2267_s2 + $0x10] sm:$0xff]  ;;  %222 = vst.msk [vmem:[#allocation6 + $0x10] sm:$0xff] %vm219_vm1, %v1654_v3  ;;  %v1837_v47 = vand.u32 127, %v248_v46 }
   0x4   :  { %1558 = vmatprep.subr.bf16.mxu0 %v1557_v5  ;;  %v1561_v14 = vpack.c.bf16 %v45_v12, %v43_v11  ;;  %v138_v15 = vld [vmem:[%s2267_s2 + $0x18] sm:$0xff]  ;;  %v42_v16 = vld [vmem:[%s2266_s1 + $0x20] sm:$0xff]  ;;  %v44_v17 = vld [vmem:[%s2266_s1 + $0x30] sm:$0xff]  ;;  %223 = vst.msk [vmem:[#allocation6 + $0x18] sm:$0xff] %vm219_vm1, %v1654_v3 }
   0x5   :  { %1566 = vmatprep.subr.bf16.mxu1 %v1565_v9  ;;  %1560 = vmatpush1.bf16.msra.mxu0 %v1559_v10  ;;  %v1569_v18 = vpack.c.bf16 %v138_v15, %v137_v13  ;;  %v1563_v19 = vpack.c.bf16 %v44_v17, %v42_v16  ;;  %v36_v20 = vld [vmem:[%s2268_s0] sm:$0xff]  ;;  %v233_v23 = vld [vmem:[%s2269_s7 + $0x8] sm:$0xff]  ;;  %v234_v25 = vld [vmem:[%s2269_s7 + $0x10] sm:$0xff] }
   0x6   :  { %v232_v21 = vld [vmem:[%s2269_s7] sm:$0xff]  ;;  %1568 = vmatpush3.bf16.msra.mxu1 %v1565_v9  ;;  %1562 = vmatprep.subr.bf16.mxu0 %v1561_v14  ;;  %v37_v24 = vld [vmem:[%s2268_s0 + $0x8] sm:$0xff]  ;;  %v235_v26 = vld [vmem:[%s2269_s7 + $0x18] sm:$0xff] }
   0x7   :  { %v224_v22 = vld [vmem:[%s2270_s6] sm:$0xff]  ;;  %1570 = vmatprep.subr.bf16.mxu1 %v1569_v18  ;;  %1458 = vmatprep.mubr.msk.f32.mxu1 %vm46_vm0, %v36_v20  ;;  %v225_v27 = vld [vmem:[%s2270_s6 + $0x8] sm:$0xff]  ;;  %v226_v30 = vld [vmem:[%s2270_s6 + $0x10] sm:$0xff] }
   0x8   :  { %291 = vperm.xlu0 %1632, %v232_v21   ;;  %251 = vperm.xlu1 %1633, %v224_v22   ;;  %v236_v28 = vld [vmem:[%s2269_s7 + $0x20] sm:$0xff]  ;;  %v237_v29 = vld [vmem:[%s2269_s7 + $0x28] sm:$0xff]  ;;  %v238_v31 = vld [vmem:[%s2269_s7 + $0x30] sm:$0xff] }
   0x9   :  { %1564 = vmatpush1.bf16.msra.mxu0 %v1563_v19  ;;  %v239_v32 = vld [vmem:[%s2269_s7 + $0x38] sm:$0xff]  ;;  %v240_v34 = vld [vmem:[%s2271_s8] sm:$0xff]  ;;  %v241_v35 = vld [vmem:[%s2271_s8 + $0x8] sm:$0xff] }
   0xa   :  { %1572 = vmatpush3.bf16.msra.mxu1 %v1569_v18  ;;  %v227_v33 = vld [vmem:[%s2270_s6 + $0x18] sm:$0xff]  ;;  %v228_v36 = vld [vmem:[%s2270_s6 + $0x20] sm:$0xff]  ;;  %v242_v37 = vld [vmem:[%s2271_s8 + $0x10] sm:$0xff] }
   0xb   :  { %v243_v38 = vld [vmem:[%s2271_s8 + $0x18] sm:$0xff]  ;;  %v229_v39 = vld [vmem:[%s2270_s6 + $0x28] sm:$0xff]  ;;  %v244_v40 = vld [vmem:[%s2271_s8 + $0x20] sm:$0xff] }
   0xc   :  { %1356 = vmatmul.mubr.msk.f32.vlgmr.msra.gmra.mrb[0].mxu0 %vm46_vm0, %v36_v20  ;;  %294 = vperm.xlu0 %1632, %v233_v23   ;;  %v245_v41 = vld [vmem:[%s2271_s8 + $0x28] sm:$0xff]  ;;  %v230_v42 = vld [vmem:[%s2270_s6 + $0x30] sm:$0xff]  ;;  %v247_v44 = vld [vmem:[%s2271_s8 + $0x38] sm:$0xff] }
   0xd   :  { %1459 = vmatmul.mubr.msk.f32.vlgmr.msra.gmra.mrb[0].mxu1 %vm46_vm0, %v37_v24  ;;  %123 = vmatprep.mubr.f32.mxu0 %v1654_v3  ;;  %v246_v43 = vld [vmem:[%s2271_s8 + $0x30] sm:$0xff]  ;;  %v231_v45 = vld [vmem:[%s2270_s6 + $0x38] sm:$0xff]  ;;  %v859_v10 = vld [vmem:[%s2272_s3] sm:$0xf] }
   0xe   :  { %297 = vperm.xlu1 %1633, %v234_v25   ;;  %463 = vmatprep.mubr.f32.mxu1 %v1654_v3  ;;  %v1001_v11 = vld [vmem:[%s2273_s4] sm:$0xff]  ;;  %v1002_v12 = vld [vmem:[%s2273_s4 + $0x8] sm:$0xff]  ;;  %v1003_v19 = vld [vmem:[%s2273_s4 + $0x10] sm:$0xff] }
   0xf   :  { %v1581_v17 = vpack.c.bf16 %v1002_v12, %v1001_v11  ;;  %v1004_v20 = vld [vmem:[%s2273_s4 + $0x18] sm:$0xff] }
  0x10   :  { %1357 = vmatmul.mubr.msk.f32.gmra.mrb[2].mxu0 %vm46_vm0, %v37_v24  ;;  %300 = vperm.xlu0 %1632, %v235_v26   ;;  %v1585_v24 = vpack.c.bf16 %v1004_v20, %v1003_v19  ;;  %v1012_v11 = vld [vmem:[%s2273_s4 + $0x58] sm:$0xff] }
  0x12   :  { %254 = vperm.xlu1 %1633, %v225_v27   ;;  %v1005_v27 = vld [vmem:[%s2273_s4 + $0x20] sm:$0xff] }
  0x14   :  { %303 = vperm.xlu0 %1632, %v236_v28   ;;  %v1006_v28 = vld [vmem:[%s2273_s4 + $0x28] sm:$0xff] }
  0x16   :  { %306 = vperm.xlu1 %1633, %v237_v29  }
  0x18   :  { %257 = vperm.xlu0 %1632, %v226_v30  }
  0x1a   :  { %309 = vperm.xlu1 %1633, %v238_v31  }
  0x1c   :  { %312 = vperm.xlu0 %1632, %v239_v32   ;;  %v1589_v32 = vpack.c.bf16 %v1006_v28, %v1005_v27 }
  0x1e   :  { %260 = vperm.xlu1 %1633, %v227_v33  }
  0x20   :  { %331 = vperm.xlu0 %1632, %v240_v34  }
  0x22   :  { %334 = vperm.xlu1 %1633, %v241_v35  }
  0x24   :  { %263 = vperm.xlu0 %1632, %v228_v36  }
  0x26   :  { %337 = vperm.xlu1 %1633, %v242_v37  }
  0x28   :  { %340 = vperm.xlu0 %1632, %v243_v38  }
  0x2a   :  { %266 = vperm.xlu1 %1633, %v229_v39  }
  0x2c   :  { %343 = vperm.xlu0 %1632, %v244_v40  }
  0x2e   :  { %346 = vperm.xlu1 %1633, %v245_v41  }
  0x30   :  { %269 = vperm.xlu0 %1632, %v230_v42  }
  0x32   :  { %349 = vperm.xlu1 %1633, %v246_v43  }
  0x34   :  { %352 = vperm.xlu0 %1632, %v247_v44  }
  0x36   :  { %272 = vperm.xlu1 %1633, %v231_v45  }
  0x87   :  { %v1839_v48 = vpop.permute.xlu0 %291  ;;  %v252_v50 = vpop.permute.xlu1 %251 }
  0x88   :  { %vm314_vm2 = vcmp.eq.s32.totalorder %v1837_v47, %v1839_v48  ;;  %vm274_vm7 = vcmp.eq.s32.totalorder %v1837_v47, %v252_v50 }
  0x89   :  { %v1847_v49 = vsel %vm314_vm2, 1.0, %v1654_v3  ;;  %v282_v23 = vsel %vm274_vm7, 1.0, %v1654_v3 }
  0x8a   :  { %1465 = vmatprep.mubr.msk.f32.mxu0 %vm219_vm1, %v1847_v49 }
  0x8b   :  { %v1851_v51 = vpop.permute.xlu0 %294 }
  0x8c   :  { %vm315_vm5 = vcmp.eq.s32.totalorder %v1837_v47, %v1851_v51 }
  0x8d   :  { %v1853_v52 = vpop.permute.xlu1 %297  ;;  %v1900_v18 = vsel %vm315_vm5, 1.0, %v1654_v3 }
  0x8e   :  { %vm316_vm6 = vcmp.eq.s32.totalorder %v1837_v47, %v1853_v52 }
  0x8f   :  { %v1855_v53 = vpop.permute.xlu0 %300  ;;  %v1912_v21 = vsel %vm316_vm6, 1.0, %v1654_v3 }
  0x90   :  { %vm317_vm8 = vcmp.eq.s32.totalorder %v1837_v47, %v1855_v53 }
  0x91   :  { %v1857_v54 = vpop.permute.xlu1 %254  ;;  %v1928_v25 = vsel %vm317_vm8, 1.0, %v1654_v3 }
  0x92   :  { %vm275_vm10 = vcmp.eq.s32.totalorder %v1837_v47, %v1857_v54 }
  0x93   :  { %v1859_v55 = vpop.permute.xlu0 %303  ;;  %v283_v30 = vsel %vm275_vm10, 1.0, %v1654_v3 }
  0x94   :  { %vm318_vm9 = vcmp.eq.s32.totalorder %v1837_v47, %v1859_v55 }
  0x95   :  { %v1861_v56 = vpop.permute.xlu1 %306  ;;  %v1943_v29 = vsel %vm318_vm9, 1.0, %v1654_v3 }
  0x96   :  { %vm319_vm11 = vcmp.eq.s32.totalorder %v1837_v47, %v1861_v56 }
  0x97   :  { %v1863_v57 = vpop.permute.xlu0 %257  ;;  %v1959_v33 = vsel %vm319_vm11, 1.0, %v1654_v3 }
  0x98   :  { %vm276_vm13 = vcmp.eq.s32.totalorder %v1837_v47, %v1863_v57 }
  0x99   :  { %v1865_v58 = vpop.permute.xlu1 %309  ;;  %v284_v36 = vsel %vm276_vm13, 1.0, %v1654_v3 }
  0x9a   :  { %vm320_vm12 = vcmp.eq.s32.totalorder %v1837_v47, %v1865_v58 }
  0x9b   :  { %v1867_v62 = vpop.permute.xlu0 %312  ;;  %v1968_v34 = vsel %vm320_vm12, 1.0, %v1654_v3 }
  0x9c   :  { %vm321_vm14 = vcmp.eq.s32.totalorder %v1837_v47, %v1867_v62 }
  0x9d   :  { %v1872_v1 = vpop.permute.xlu1 %260  ;;  %v1984_v37 = vsel %vm321_vm14, 1.0, %v1654_v3 }
  0x9e   :  { %vm277_vm0 = vcmp.eq.s32.totalorder %v1837_v47, %v1872_v1 }
  0x9f   :  { %v1875_v5 = vpop.permute.xlu0 %331  ;;  %v285_v40 = vsel %vm277_vm0, 1.0, %v1654_v3 }
  0xa0   :  { %vm354_vm15 = vcmp.eq.s32.totalorder %v1837_v47, %v1875_v5  ;;  %v1008_v5 = vld [vmem:[%s2273_s4 + $0x38] sm:$0xff] }
  0xa1   :  { %v1877_v8 = vpop.permute.xlu1 %334  ;;  %v1990_v38 = vsel %vm354_vm15, 1.0, %v1654_v3 }
  0xa3   :  { %v1892_v15 = vpop.permute.xlu0 %263 }
  0xa4   :  { %vm278_vm10 = vcmp.eq.s32.totalorder %v1837_v47, %v1892_v15 }
  0xa5   :  { %v338_v22 = vpop.permute.xlu1 %337  ;;  %v286_v44 = vsel %vm278_vm10, 1.0, %v1654_v3 }
  0xa6   :  { %vm356_vm7 = vcmp.eq.s32.totalorder %v1837_v47, %v338_v22 }
  0xa7   :  { %v341_v26 = vpop.permute.xlu0 %340  ;;  %v2008_v43 = vsel %vm356_vm7, 1.0, %v1654_v3 }
  0xa8   :  { %vm357_vm13 = vcmp.eq.s32.totalorder %v1837_v47, %v341_v26 }
  0xa9   :  { %v267_v31 = vpop.permute.xlu1 %266  ;;  %v2019_v50 = vsel %vm357_vm13, 1.0, %v1654_v3 }
  0xaa   :  { %vm279_vm0 = vcmp.eq.s32.totalorder %v1837_v47, %v267_v31 }
  0xab   :  { %v344_v35 = vpop.permute.xlu0 %343 }
  0xac   :  { %vm358_vm15 = vcmp.eq.s32.totalorder %v1837_v47, %v344_v35 }
  0xad   :  { %v347_v39 = vpop.permute.xlu1 %346  ;;  %v2024_v54 = vsel %vm358_vm15, 1.0, %v1654_v3 }
  0xaf   :  { %v270_v42 = vpop.permute.xlu0 %269 }
  0xb0   :  { %vm280_vm10 = vcmp.eq.s32.totalorder %v1837_v47, %v270_v42 }
  0xb1   :  { %v350_v45 = vpop.permute.xlu1 %349 }
  0xb2   :  { %vm360_vm7 = vcmp.eq.s32.totalorder %v1837_v47, %v350_v45 }
  0xb3   :  { %v353_v57 = vpop.permute.xlu0 %352 }
  0xb4   :  { %vm361_vm13 = vcmp.eq.s32.totalorder %v1837_v47, %v353_v57 }
  0xb5   :  { %v2050_v1 = vsel %vm361_vm13, 1.0, %v1654_v3 }
  0xdf   :  { %v119_v59 = vpop.f32.mrb[0].mxu0 }
  0xe0   :  { %v1460_v60 = vpop.f32.mrb[0].mxu1  ;;  %v121_v61 = vpop.f32.mrb[1].mxu0 }
  0xe1   :  { %215 = vst.msk [vmem:[#allocation3 + $0x8] sm:$0xff] %vm131_vm3, %v1460_v60  ;;  %v205_v63 = vpop.f32.mrb[1].mxu1  ;;  %132 = vst.msk [vmem:[#allocation2 + $0x8] sm:$0xff] %vm131_vm3, %v121_v61  ;;  %v2040_v61 = vsel %vm360_vm7, 1.0, %v1654_v3 }
  0xe2   :  { %214 = vst.msk [vmem:[#allocation3] sm:$0xff] %vm131_vm3, %v205_v63  ;;  %v273_v63 = vpop.permute.xlu1 %272 }
  0xe3   :  { %v125_v0 = vpop.f32.mrb[2].mxu0  ;;  %vm281_vm15 = vcmp.eq.s32.totalorder %v1837_v47, %v273_v63 }
  0xe4   :  { %v127_v2 = vpop.f32.mrb[3].mxu0  ;;  %v1575_v4 = vpack.c.bf16 %v125_v0, %v119_v59  ;;  %v287_v59 = vsel %vm279_vm0, 1.0, %v1654_v3  ;;  %v288_v0 = vsel %vm280_vm10, 1.0, %v1654_v3  ;;  %vm2276_vm0 = vcmask 122880  }
  0xe5   :  { %134 = vst.msk [vmem:[#allocation2 + $0x18] sm:$0xff] %vm131_vm3, %v127_v2  ;;  %v289_v2 = vsel %vm281_vm15, 1.0, %v1654_v3 }
  0xe6   :  { %218 = vst.msk [vmem:[#allocation5] sm:$0x1] %vm2276_vm0, %v1654_v3 }
  0xe8   :  { %v513_v6 = vld [vmem:[#allocation3 + $0x8] sm:$0xff] }
  0xe9   :  { %v512_v7 = vld [vmem:[#allocation3] sm:$0xff]  ;;  %v371_v13 = vld [vmem:[#allocation2 + $0x8] sm:$0xff] }
  0xea   :  { %v1577_v9 = vpack.c.bf16 %v513_v6, %v512_v7  ;;  %v1009_v7 = vld [vmem:[%s2273_s4 + $0x40] sm:$0xff] }
  0xec   :  { %1578 = vmatprep.subr.bf16.mxu0 %v1577_v9  ;;  %v373_v14 = vld [vmem:[#allocation2 + $0x18] sm:$0xff] }
  0xed   :  { %1580 = vmatpush3.bf16.msra.mxu0 %v1577_v9  ;;  %v1573_v16 = vpack.c.bf16 %v373_v14, %v371_v13  ;;  %v1013_v13 = vld [vmem:[%s2273_s4 + $0x60] sm:$0xff]  ;;  %v1014_v14 = vld [vmem:[%s2273_s4 + $0x68] sm:$0xff] }
  0xee   :  { %1477 = vmatprep.subr.msk.mxu0 %vm884_vm4, %v859_v10  ;;  %v1605_v15 = vpack.c.bf16 %v1014_v14, %v1013_v13 }
  0xef   :  { %1574 = vmatprep.subr.bf16.mxu1 %v1573_v16  ;;  %v1015_v16 = vld [vmem:[%s2273_s4 + $0x70] sm:$0xff] }
  0xf0   :  { %1466 = vmatmul.mubr.msk.f32.vlgmr.msra.gmra.mrb[4].mxu0 %vm219_vm1, %v1900_v18  ;;  %1576 = vmatpush1.bf16.msra.mxu1 %v1575_v4  ;;  %v1007_v4 = vld [vmem:[%s2273_s4 + $0x30] sm:$0xff] }
  0xf1   :  { %1468 = vmatprep.mubr.msk.f32.mxu0 %vm219_vm1, %v1912_v21  ;;  %1478 = vmatpush3.msk.msra.mxu0 %vm884_vm4, %v859_v10  ;;  %vm355_vm4 = vcmp.eq.s32.totalorder %v1837_v47, %v1877_v8  ;;  %v1593_v6 = vpack.c.bf16 %v1008_v5, %v1007_v4  ;;  %v1010_v8 = vld [vmem:[%s2273_s4 + $0x48] sm:$0xff]  ;;  %v1011_v10 = vld [vmem:[%s2273_s4 + $0x50] sm:$0xff] }
  0xf2   :  { %1582 = vmatprep.subr.bf16.mxu1 %v1581_v17  ;;  %v2002_v41 = vsel %vm355_vm4, 1.0, %v1654_v3  ;;  %vm359_vm4 = vcmp.eq.s32.totalorder %v1837_v47, %v347_v39  ;;  %v1597_v9 = vpack.c.bf16 %v1010_v8, %v1009_v7  ;;  %v1601_v12 = vpack.c.bf16 %v1012_v11, %v1011_v10 }
  0xf3   :  { %1360 = vmatmul.mubr.msk.f32.vlgmr.msra.gmra.mrb[2].mxu1 %vm219_vm1, %v282_v23  ;;  %v2035_v60 = vsel %vm359_vm4, 1.0, %v1654_v3  ;;  %v785_v47 = vshrl.u32 %v248_v46, 7 }
  0xf4   :  { %1469 = vmatmul.mubr.msk.f32.gmra.mrb[6].mxu0 %vm219_vm1, %v1928_v25  ;;  %469 = vmatprep.mubr.f32.mxu1 %v1654_v3 }
  0xf5   :  { %1471 = vmatprep.mubr.msk.f32.mxu0 %vm219_vm1, %v1943_v29  ;;  %1584 = vmatpush3.bf16.msra.mxu1 %v1581_v17  ;;  %v1016_v17 = vld [vmem:[%s2273_s4 + $0x78] sm:$0xff] }
  0xf6   :  { %1586 = vmatprep.subr.bf16.mxu1 %v1585_v24  ;;  %v1609_v19 = vpack.c.bf16 %v1016_v17, %v1015_v16 }
  0xf7   :  { %1361 = vmatmul.mubr.msk.f32.gmra.mrb[4].mxu1 %vm219_vm1, %v283_v30 }
  0xf8   :  { %1472 = vmatmul.mubr.msk.f32.gmra.mrb[8].mxu0 %vm219_vm1, %v1959_v33  ;;  %475 = vmatprep.mubr.f32.mxu1 %v1654_v3 }
  0xf9   :  { %1474 = vmatprep.mubr.msk.f32.mxu0 %vm219_vm1, %v1968_v34  ;;  %1588 = vmatpush3.bf16.msra.mxu1 %v1585_v24 }
  0xfa   :  { %1590 = vmatprep.subr.bf16.mxu1 %v1589_v32 }
  0xfb   :  { %1362 = vmatmul.mubr.msk.f32.gmra.mrb[6].mxu1 %vm219_vm1, %v284_v36 }
  0xfc   :  { %1475 = vmatmul.mubr.msk.f32.gmra.mrb[10].mxu0 %vm219_vm1, %v1984_v37  ;;  %481 = vmatprep.mubr.f32.mxu1 %v1654_v3 }
  0xfd   :  { %1479 = vmatprep.mubr.msk.f32.mxu0 %vm131_vm3, %v1990_v38  ;;  %1592 = vmatpush3.bf16.msra.mxu1 %v1589_v32 }
  0xfe   :  { %1594 = vmatprep.subr.bf16.mxu1 %v1593_v6 }
  0xff   :  { %1363 = vmatmul.mubr.msk.f32.gmra.mrb[8].mxu1 %vm219_vm1, %v285_v40 }
 0x100   :  { %1480 = vmatmul.mubr.msk.f32.vlgmr.msra.gmra.mrb[12].mxu0 %vm131_vm3, %v2002_v41  ;;  %487 = vmatprep.mubr.f32.mxu1 %v1654_v3 }
 0x101   :  { %1482 = vmatprep.mubr.msk.f32.mxu0 %vm131_vm3, %v2008_v43  ;;  %1596 = vmatpush3.bf16.msra.mxu1 %v1593_v6 }
 0x102   :  { %1598 = vmatprep.subr.bf16.mxu1 %v1597_v9 }
 0x103   :  { %1364 = vmatmul.mubr.msk.f32.gmra.mrb[10].mxu1 %vm219_vm1, %v286_v44 }
 0x104   :  { %1483 = vmatmul.mubr.msk.f32.gmra.mrb[14].mxu0 %vm131_vm3, %v2019_v50  ;;  %493 = vmatprep.mubr.f32.mxu1 %v1654_v3 }
 0x105   :  { %1485 = vmatprep.mubr.msk.f32.mxu0 %vm131_vm3, %v2024_v54  ;;  %1600 = vmatpush3.bf16.msra.mxu1 %v1597_v9 }
 0x106   :  { %1602 = vmatprep.subr.bf16.mxu1 %v1601_v12 }
 0x107   :  { %1365 = vmatmul.mubr.msk.f32.gmra.mrb[12].mxu1 %vm219_vm1, %v287_v59 }
 0x108   :  { %1486 = vmatmul.mubr.msk.f32.gmra.mrb[16].mxu0 %vm131_vm3, %v2035_v60  ;;  %499 = vmatprep.mubr.f32.mxu1 %v1654_v3 }
 0x109   :  { %1488 = vmatprep.mubr.msk.f32.mxu0 %vm131_vm3, %v2040_v61  ;;  %1604 = vmatpush3.bf16.msra.mxu1 %v1601_v12 }
 0x10a   :  { %1606 = vmatprep.subr.bf16.mxu1 %v1605_v15 }
 0x10b   :  { %1366 = vmatmul.mubr.msk.f32.gmra.mrb[14].mxu1 %vm219_vm1, %v288_v0 }
 0x10c   :  { %1489 = vmatmul.mubr.msk.f32.gmra.mrb[18].mxu0 %vm131_vm3, %v2050_v1  ;;  %505 = vmatprep.mubr.f32.mxu1 %v1654_v3 }
 0x10d   :  { %1608 = vmatpush3.bf16.msra.mxu1 %v1605_v15 }
 0x10e   :  { %1610 = vmatprep.subr.bf16.mxu1 %v1609_v19 }
 0x10f   :  { %1367 = vmatmul.mubr.msk.f32.gmra.mrb[16].mxu1 %vm219_vm1, %v289_v2 }
 0x111   :  { %1612 = vmatpush3.bf16.msra.mxu1 %v1609_v19 }
 0x1c3   :  { %v1467_v20 = vpop.f32.mrb[4].mxu0 }
 0x1c4   :  { %v644_v22 = vmul.f32 %v1467_v20, %v2002_v41  ;;  %v604_v23 = vpop.f32.mrb[5].mxu0 }
 0x1c5   :  { %v643_v24 = vmul.f32 %v604_v23, %v1990_v38 }
 0x1c6   :  { %v655_v26 = vsel %vm131_vm3, %v644_v22, 0.0  ;;  %v465_v27 = vpop.f32.mrb[2].mxu1 }
 0x1c7   :  { %656 = vadd.xlane.f32.xlu1 %v655_v26  ;;  %v1470_v28 = vpop.f32.mrb[6].mxu0  ;;  %v652_v30 = vsel %vm131_vm3, %v643_v24, 0.0  ;;  %v467_v31 = vpop.f32.mrb[3].mxu1 }
 0x1c8   :  { %v646_v32 = vmul.f32 %v1470_v28, %v2019_v50  ;;  %653 = vadd.xlane.f32.xlu0 %v652_v30  ;;  %v676_v35 = vmul.f32 %v467_v31, %v1990_v38  ;;  %v614_v36 = vpop.f32.mrb[7].mxu0 }
 0x1c9   :  { %v645_v44 = vmul.f32 %v614_v36, %v2008_v43 }
 0x1ca   :  { %v471_v39 = vpop.f32.mrb[4].mxu1  ;;  %v661_v40 = vsel %vm131_vm3, %v646_v32, 0.0  ;;  %v684_v42 = vsel %vm131_vm3, %v676_v35, 0.0 }
 0x1cb   :  { %v1473_v45 = vpop.f32.mrb[8].mxu0  ;;  %685 = vadd.xlane.f32.xlu1 %v684_v42  ;;  %v473_v57 = vpop.f32.mrb[5].mxu1  ;;  %v658_v38 = vsel %vm131_vm3, %v645_v44, 0.0 }
 0x1cc   :  { %662 = vadd.xlane.f32.xlu0 %v661_v40  ;;  %v624_v59 = vpop.f32.mrb[9].mxu0  ;;  %v648_v2 = vmul.f32 %v1473_v45, %v2035_v60  ;;  %v677_v10 = vmul.f32 %v473_v57, %v2002_v41 }
 0x1cd   :  { %v647_v63 = vmul.f32 %v624_v59, %v2024_v54 }
 0x1ce   :  { %v477_v0 = vpop.f32.mrb[6].mxu1  ;;  %v667_v12 = vsel %vm131_vm3, %v648_v2, 0.0  ;;  %v687_v41 = vsel %vm131_vm3, %v677_v10, 0.0 }
 0x1cf   :  { %v1476_v4 = vpop.f32.mrb[10].mxu0  ;;  %v664_v5 = vsel %vm131_vm3, %v647_v63, 0.0  ;;  %v479_v6 = vpop.f32.mrb[7].mxu1 }
 0x1d0   :  { %659 = vadd.xlane.f32.xlu0 %v658_v38  ;;  %v634_v7 = vpop.f32.mrb[11].mxu0  ;;  %665 = vadd.xlane.f32.xlu1 %v664_v5  ;;  %v678_v15 = vmul.f32 %v479_v6, %v2008_v43  ;;  %v650_v22 = vmul.f32 %v1476_v4, %v2050_v1 }
 0x1d1   :  { %v649_v8 = vmul.f32 %v634_v7, %v2040_v61 }
 0x1d2   :  { %v483_v9 = vpop.f32.mrb[8].mxu1  ;;  %v690_v30 = vsel %vm131_vm3, %v678_v15, 0.0 }
 0x1d3   :  { %v1481_v11 = vpop.f32.mrb[12].mxu0  ;;  %v670_v13 = vsel %vm131_vm3, %v649_v8, 0.0  ;;  %v485_v14 = vpop.f32.mrb[9].mxu1 }
 0x1d4   :  { %v994_v16 = vmul.f32 %v1481_v11, %v471_v39  ;;  %668 = vadd.xlane.f32.xlu0 %v667_v12  ;;  %v954_v17 = vpop.f32.mrb[13].mxu0  ;;  %671 = vadd.xlane.f32.xlu1 %v670_v13  ;;  %v679_v35 = vmul.f32 %v485_v14, %v2019_v50  ;;  %v673_v39 = vsel %vm131_vm3, %v650_v22, 0.0 }
 0x1d5   :  { %v993_v19 = vmul.f32 %v954_v17, %v465_v27 }
 0x1d6   :  { %v489_v20 = vpop.f32.mrb[10].mxu1  ;;  %v693_v63 = vsel %vm131_vm3, %v679_v35, 0.0 }
 0x1d7   :  { %v1484_v23 = vpop.f32.mrb[14].mxu0  ;;  %1523 = vmatprep.mubr.f32.mxu1 %v993_v19  ;;  %v491_v24 = vpop.f32.mrb[11].mxu1 }
 0x1d8   :  { %v996_v26 = vmul.f32 %v1484_v23, %v483_v9  ;;  %v964_v28 = vpop.f32.mrb[15].mxu0  ;;  %1524 = vmatmul.mubr.f32.vlgmr.msra.gmra.mrb[18].mxu1 %v994_v16  ;;  %688 = vadd.xlane.f32.xlu0 %v687_v41  ;;  %v680_v43 = vmul.f32 %v491_v24, %v2024_v54 }
 0x1d9   :  { %v995_v31 = vmul.f32 %v964_v28, %v477_v0  ;;  %691 = vadd.xlane.f32.xlu1 %v690_v30 }
 0x1da   :  { %v495_v32 = vpop.f32.mrb[12].mxu1  ;;  %v696_v27 = vsel %vm131_vm3, %v680_v43, 0.0 }
 0x1db   :  { %v1487_v36 = vpop.f32.mrb[16].mxu0  ;;  %1526 = vmatprep.mubr.f32.mxu1 %v995_v31  ;;  %v497_v40 = vpop.f32.mrb[13].mxu1 }
 0x1dc   :  { %v998_v42 = vmul.f32 %v1487_v36, %v495_v32  ;;  %v974_v44 = vpop.f32.mrb[17].mxu0  ;;  %674 = vadd.xlane.f32.xlu0 %v673_v39  ;;  %1527 = vmatmul.mubr.f32.gmra.mrb[20].mxu1 %v996_v26  ;;  %v681_v54 = vmul.f32 %v497_v40, %v2035_v60 }
 0x1dd   :  { %v997_v45 = vmul.f32 %v974_v44, %v489_v20  ;;  %697 = vadd.xlane.f32.xlu1 %v696_v27 }
 0x1de   :  { %v501_v57 = vpop.f32.mrb[14].mxu1  ;;  %v699_v7 = vsel %vm131_vm3, %v681_v54, 0.0 }
 0x1df   :  { %v1490_v59 = vpop.f32.mrb[18].mxu0  ;;  %1529 = vmatprep.mubr.f32.mxu1 %v997_v45  ;;  %v503_v0 = vpop.f32.mrb[15].mxu1 }
 0x1e0   :  { %v984_v50 = vpop.f32.mrb[19].mxu0  ;;  %694 = vadd.xlane.f32.xlu0 %v693_v63  ;;  %v682_v2 = vmul.f32 %v503_v0, %v2040_v61  ;;  %1530 = vmatmul.mubr.f32.gmra.mrb[22].mxu1 %v998_v42  ;;  %v1656_v61 = vmov -1e+30  }
 0x1e1   :  { %v999_v4 = vmul.f32 %v984_v50, %v501_v57  ;;  %217 = vst.msk [vmem:[#allocation4] sm:$0x1] %vm2276_vm0, %v1656_v61 }
 0x1e2   :  { %v507_v38 = vpop.f32.mrb[16].mxu1  ;;  %v702_v5 = vsel %vm131_vm3, %v682_v2, 0.0 }
 0x1e3   :  { %v1000_v6 = vmul.f32 %v1490_v59, %v507_v38  ;;  %1532 = vmatprep.mubr.f32.mxu1 %v999_v4  ;;  %703 = vadd.xlane.f32.xlu1 %v702_v5  ;;  %v509_v60 = vpop.f32.mrb[17].mxu1 }
 0x1e4   :  { %700 = vadd.xlane.f32.xlu0 %v699_v7  ;;  %v683_v8 = vmul.f32 %v509_v60, %v2050_v1 }
 0x1e5   :  { %1533 = vmatmul.mubr.f32.gmra.mrb[24].mxu1 %v1000_v6 }
 0x1e6   :  { %v705_v9 = vsel %vm131_vm3, %v683_v8, 0.0 }
 0x1e8   :  { %706 = vadd.xlane.f32.xlu0 %v705_v9 }
 0x254   :  { %v657_v10 = vpop.xlane.xlu1 %656 }
 0x255   :  { %v654_v11 = vpop.xlane.xlu0 %653 }
 0x258   :  { %v686_v12 = vpop.xlane.xlu1 %685 }
 0x259   :  { %v663_v13 = vpop.xlane.xlu0 %662  ;;  %v708_v24 = vadd.f32 %v686_v12, %v654_v11 }
 0x25b   :  { %vm716_vm4 = vcmp.ge.f32.partialorder %v708_v24, 0.0  ;;  %v724_v32 = vmul.f32 0.2, %v708_v24 }
 0x25d   :  { %v660_v14 = vpop.xlane.xlu0 %659  ;;  %v666_v15 = vpop.xlane.xlu1 %665  ;;  %v2129_v54 = vsel %vm716_vm4, %v708_v24, %v724_v32  ;;  %v769_v24 = vld [vmem:[#allocation4] sm:$0x1] }
 0x25e   :  { %v740_v55 = vsel %vm314_vm2, %v2129_v54, -1e+30  ;;  %vm2277_vm2 = vcmask 122880  }
 0x25f   :  { %v748_v11 = vsel %vm219_vm1, %v740_v55, -inf  ;;  %v779_v55 = vld [vmem:[#allocation6] sm:$0xff] }
 0x261   :  { %v669_v16 = vpop.xlane.xlu0 %668  ;;  %v672_v17 = vpop.xlane.xlu1 %671 }
 0x265   :  { %v689_v1 = vpop.xlane.xlu0 %688 }
 0x266   :  { %v692_v19 = vpop.xlane.xlu1 %691  ;;  %v709_v22 = vadd.f32 %v689_v1, %v657_v10 }
 0x267   :  { %v710_v30 = vadd.f32 %v692_v19, %v660_v14 }
 0x268   :  { %v725_v28 = vmul.f32 0.2, %v709_v22  ;;  %vm717_vm3 = vcmp.ge.f32.partialorder %v709_v22, 0.0 }
 0x269   :  { %v675_v20 = vpop.xlane.xlu0 %674  ;;  %v726_v39 = vmul.f32 0.2, %v710_v30  ;;  %vm718_vm10 = vcmp.ge.f32.partialorder %v710_v30, 0.0 }
 0x26a   :  { %v698_v23 = vpop.xlane.xlu1 %697  ;;  %v2124_v36 = vsel %vm717_vm3, %v709_v22, %v725_v28 }
 0x26b   :  { %v712_v41 = vadd.f32 %v698_v23, %v666_v15  ;;  %v741_v59 = vsel %vm315_vm5, %v2124_v36, -1e+30  ;;  %v2137_v50 = vsel %vm718_vm10, %v710_v30, %v726_v39 }
 0x26c   :  { %v742_v56 = vsel %vm316_vm6, %v2137_v50, -1e+30  ;;  %v749_v8 = vsel %vm219_vm1, %v741_v59, -inf  ;;  %vm2278_vm6 = vmmov %vm2277_vm2 }
 0x26d   :  { %v695_v26 = vpop.xlane.xlu0 %694  ;;  %v728_v3 = vmul.f32 0.2, %v712_v41  ;;  %vm720_vm7 = vcmp.ge.f32.partialorder %v712_v41, 0.0  ;;  %v750_v12 = vsel %vm219_vm1, %v742_v56, -inf  ;;  %v782_v56 = vld [vmem:[#allocation6 + $0x18] sm:$0xff] }
 0x26e   :  { %v711_v43 = vadd.f32 %v695_v26, %v663_v13  ;;  %v2182_v26 = vsub.s32 0, %v785_v47  ;;  %v1318_v47 = vld [vmem:[%s2274_s5 + $0x10] sm:$0xff] }
 0x26f   :  { %v2126_v45 = vsel %vm720_vm7, %v712_v41, %v728_v3 }
 0x270   :  { %v704_v31 = vpop.xlane.xlu1 %703  ;;  %v727_v40 = vmul.f32 0.2, %v711_v43  ;;  %vm719_vm13 = vcmp.ge.f32.partialorder %v711_v43, 0.0  ;;  %v744_v5 = vsel %vm318_vm9, %v2126_v45, -1e+30  ;;  %vm2279_vm9 = vmmov %vm2277_vm2 }
 0x271   :  { %v701_v27 = vpop.xlane.xlu0 %700  ;;  %v714_v35 = vadd.f32 %v704_v31, %v672_v17  ;;  %v752_v9 = vsel %vm219_vm1, %v744_v5, -inf }
 0x272   :  { %v713_v42 = vadd.f32 %v701_v27, %v669_v16  ;;  %v2139_v2 = vsel %vm719_vm13, %v711_v43, %v727_v40  ;;  %v753_v14 = vmax.f32 %v748_v11, %v752_v9  ;;  %v781_v9 = vld [vmem:[#allocation6 + $0x10] sm:$0xff] }
 0x273   :  { %vm722_vm15 = vcmp.ge.f32.partialorder %v714_v35, 0.0  ;;  %v730_v44 = vmul.f32 0.2, %v714_v35  ;;  %v743_v58 = vsel %vm317_vm8, %v2139_v2, -1e+30  ;;  %vm1190_vm8 = vcmask 523264  }
 0x274   :  { %vm721_vm0 = vcmp.ge.f32.partialorder %v713_v42, 0.0  ;;  %v729_v57 = vmul.f32 0.2, %v713_v42  ;;  %v751_v53 = vsel %vm219_vm1, %v743_v58, -inf }
 0x275   :  { %v2135_v63 = vsel %vm722_vm15, %v714_v35, %v730_v44  ;;  %v707_v0 = vpop.xlane.xlu0 %706 }
 0x276   :  { %v2141_v4 = vsel %vm721_vm0, %v713_v42, %v729_v57  ;;  %v715_v38 = vadd.f32 %v707_v0, %v675_v20  ;;  %v746_v6 = vsel %vm320_vm12, %v2135_v63, -1e+30 }
 0x277   :  { %v745_v51 = vsel %vm319_vm11, %v2141_v4, -1e+30  ;;  %v756_v61 = vsel %vm219_vm1, %v746_v6, -inf  ;;  %v776_v6 = vld [vmem:[#allocation5] sm:$0x1] }
 0x278   :  { %v754_v7 = vsel %vm219_vm1, %v745_v51, -inf  ;;  %vm723_vm5 = vcmp.ge.f32.partialorder %v715_v38, 0.0  ;;  %v731_v60 = vmul.f32 0.2, %v715_v38  ;;  %v757_v15 = vmax.f32 %v750_v12, %v756_v61 }
 0x279   :  { %v755_v48 = vmax.f32 %v749_v8, %v754_v7 }
 0x27a   :  { %v2171_v10 = vsel %vm723_vm5, %v715_v38, %v731_v60  ;;  %v780_v60 = vld [vmem:[#allocation6 + $0x8] sm:$0xff] }
 0x27b   :  { %v747_v52 = vsel %vm321_vm14, %v2171_v10, -1e+30  ;;  %v760_v17 = vmax.f32 %v753_v14, %v755_v48 }
 0x27c   :  { %v758_v13 = vsel %vm219_vm1, %v747_v52, -inf }
 0x27d   :  { %v759_v16 = vmax.f32 %v751_v53, %v758_v13 }
 0x27f   :  { %v761_v1 = vmax.f32 %v757_v15, %v759_v16 }
 0x281   :  { %v762_v19 = vmax.f32 %v760_v17, %v761_v1 }
 0x283   :  { %v763_v20 = vrot.slane %v762_v19, 4 }
 0x285   :  { %v764_v22 = vmax.f32 %v762_v19, %v763_v20  ;;  %v1316_v19 = vld [vmem:[%s2274_s5] sm:$0xff] }
 0x287   :  { %v765_v23 = vrot.slane %v764_v22, 2 }
 0x289   :  { %v766_v62 = vmax.f32 %v764_v22, %v765_v23  ;;  %v1317_v23 = vld [vmem:[%s2274_s5 + $0x8] sm:$0xff] }
 0x28b   :  { %v767_v41 = vrot.slane %v766_v62, 1 }
 0x28d   :  { %v768_v28 = vmax.f32 %v766_v62, %v767_v41  ;;  %v1319_v62 = vld [vmem:[%s2274_s5 + $0x18] sm:$0xff] }
 0x28f   :  { %v770_v30 = vmax.f32 %v769_v24, %v768_v28 }
 0x291   :  { %772 = vst.msk [vmem:[#allocation4] sm:$0x1] %vm2277_vm2, %v770_v30  ;;  %v773_v43 = vsub.f32 %v769_v24, %v770_v30  ;;  %v801_v3 = vrot.slane %v770_v30, %v2182_v26 }
 0x293   :  { %v774_v31 = vmul.f32 1.442695, %v773_v43  ;;  %v804_v32 = vmul.f32 %v801_v3, %v1900_v18  ;;  %v803_v27 = vmul.f32 %v801_v3, %v1847_v49  ;;  %v806_v35 = vmul.f32 %v801_v3, %v1928_v25 }
 0x294   :  { %v805_v40 = vmul.f32 %v801_v3, %v1912_v21  ;;  %v808_v57 = vmul.f32 %v801_v3, %v1959_v33  ;;  %v807_v59 = vmul.f32 %v801_v3, %v1943_v29  ;;  %v810_v5 = vmul.f32 %v801_v3, %v1984_v37 }
 0x295   :  { %1634 = vpow2.f32 %v774_v31  ;;  %v814_v46 = vsel %vm219_vm1, %v804_v32, 0.0  ;;  %v811_v39 = vsel %vm219_vm1, %v803_v27, 0.0  ;;  %v820_v42 = vsel %vm219_vm1, %v806_v35, 0.0 }
 0x296   :  { %815 = vadd.xlane.f32.xlu0 %v814_v46  ;;  %812 = vadd.xlane.f32.xlu1 %v811_v39  ;;  %v817_v44 = vsel %vm219_vm1, %v805_v40, 0.0  ;;  %v826_v0 = vsel %vm219_vm1, %v808_v57, 0.0  ;;  %v823_v38 = vsel %vm219_vm1, %v807_v59, 0.0  ;;  %v809_v51 = vmul.f32 %v801_v3, %v1968_v34 }
 0x297   :  { %v832_v61 = vsel %vm219_vm1, %v810_v5, 0.0 }
 0x298   :  { %v829_v48 = vsel %vm219_vm1, %v809_v51, 0.0 }
 0x29a   :  { %821 = vadd.xlane.f32.xlu0 %v820_v42  ;;  %818 = vadd.xlane.f32.xlu1 %v817_v44 }
 0x29e   :  { %827 = vadd.xlane.f32.xlu0 %v826_v0  ;;  %824 = vadd.xlane.f32.xlu1 %v823_v38 }
 0x29f   :  { %v1635_v7 = vpop.eup %1634 }
 0x2a0   :  { %v777_v58 = vmul.f32 %v1635_v7, %v776_v6  ;;  %v787_v8 = vrot.slane %v1635_v7, %v2182_v26 }
 0x2a2   :  { %833 = vadd.xlane.f32.xlu0 %v832_v61  ;;  %830 = vadd.xlane.f32.xlu1 %v829_v48  ;;  %778 = vst.msk [vmem:[#allocation5] sm:$0x1] %vm2278_vm6, %v777_v58  ;;  %v790_v52 = vmul.f32 %v787_v8, %v780_v60  ;;  %v789_v11 = vmul.f32 %v787_v8, %v779_v55 }
 0x2a3   :  { %v792_v12 = vmul.f32 %v787_v8, %v782_v56  ;;  %v791_v53 = vmul.f32 %v787_v8, %v781_v9 }
 0x2a4   :  { %794 = vst.msk [vmem:[#allocation6 + $0x8] sm:$0xff] %vm219_vm1, %v790_v52  ;;  %793 = vst.msk [vmem:[#allocation6] sm:$0xff] %vm219_vm1, %v789_v11 }
 0x2a5   :  { %796 = vst.msk [vmem:[#allocation6 + $0x18] sm:$0xff] %vm219_vm1, %v792_v12  ;;  %795 = vst.msk [vmem:[#allocation6 + $0x10] sm:$0xff] %vm219_vm1, %v791_v53 }
 0x2ab   :  { %v1525_v13 = vpop.f32.mrb[18].mxu1 }
 0x2ac   :  { %v1083_v14 = vpop.f32.mrb[19].mxu1 }
 0x2af   :  { %v1528_v15 = vpop.f32.mrb[20].mxu1 }
 0x2b0   :  { %v1093_v16 = vpop.f32.mrb[21].mxu1 }
 0x2b3   :  { %v1531_v17 = vpop.f32.mrb[22].mxu1 }
 0x2b4   :  { %v1103_v1 = vpop.f32.mrb[23].mxu1 }
 0x2b8   :  { %1322 = vperm.xlu0 %1632, %v1316_v19   ;;  %v1534_v20 = vpop.f32.mrb[24].mxu1 }
 0x2b9   :  { %v1113_v22 = vpop.f32.mrb[25].mxu1 }
 0x2bc   :  { %1327 = vperm.xlu0 %1632, %v1317_v23  }
 0x2c0   :  { %1332 = vperm.xlu0 %1632, %v1318_v47  }
 0x2c4   :  { %1337 = vperm.xlu0 %1632, %v1319_v62  }
 0x2d5   :  { %1158 = vxpose.xlu1.b32.start [1/8] (short) (narrow) %v1083_v14, 32 }
 0x2d9   :  { %1159 = vxpose.xlu1.b32.cont [2/8] (short) (narrow) %v1525_v13, 32 }
 0x2dd   :  { %1160 = vxpose.xlu1.b32.cont [3/8] (short) (narrow) %v1093_v16, 32 }
 0x2e1   :  { %1161 = vxpose.xlu1.b32.cont [4/8] (short) (narrow) %v1528_v15, 32 }
 0x2e5   :  { %1162 = vxpose.xlu1.b32.cont [5/8] (short) (narrow) %v1103_v1, 32 }
 0x2e9   :  { %1163 = vxpose.xlu1.b32.cont [6/8] (short) (narrow) %v1531_v17, 32 }
 0x2ed   :  { %1164 = vxpose.xlu1.b32.cont [7/8] (short) (narrow) %v1113_v22, 32 }
 0x2f1   :  { %1165 = vxpose.xlu1.b32.end [8/8] (short) (narrow) %v1534_v20, 32 }
 0x323   :  { %v816_v41 = vpop.xlane.xlu0 %815  ;;  %v813_v24 = vpop.xlane.xlu1 %812 }
 0x324   :  { %v836_v28 = vsub.f32 %v2124_v36, %v816_v41  ;;  %v835_v30 = vsub.f32 %v2129_v54, %v813_v24 }
 0x326   :  { %v845_v43 = vmul.f32 1.442695, %v836_v28  ;;  %v843_v3 = vmul.f32 1.442695, %v835_v30  ;;  %v1130_v30 = vld [vmem:[#allocation5] sm:$0x1] }
 0x327   :  { %v822_v31 = vpop.xlane.xlu0 %821  ;;  %v819_v32 = vpop.xlane.xlu1 %818 }
 0x328   :  { %1636 = vpow2.f32 %v845_v43  ;;  %v838_v27 = vsub.f32 %v2139_v2, %v822_v31  ;;  %v837_v35 = vsub.f32 %v2137_v50, %v819_v32 }
 0x329   :  { %1638 = vpow2.f32 %v843_v3 }
 0x32a   :  { %v849_v46 = vmul.f32 1.442695, %v838_v27  ;;  %v847_v39 = vmul.f32 1.442695, %v837_v35 }
 0x32b   :  { %v828_v40 = vpop.xlane.xlu0 %827  ;;  %v825_v42 = vpop.xlane.xlu1 %824 }
 0x32c   :  { %1640 = vpow2.f32 %v849_v46  ;;  %v840_v44 = vsub.f32 %v2141_v4, %v828_v40  ;;  %v839_v36 = vsub.f32 %v2126_v45, %v825_v42 }
 0x32d   :  { %1642 = vpow2.f32 %v847_v39  ;;  %v1155_v39 = vld [vmem:[#allocation6 + $0x8] sm:$0xff] }
 0x32e   :  { %v853_v54 = vmul.f32 1.442695, %v840_v44  ;;  %v851_v57 = vmul.f32 1.442695, %v839_v36  ;;  %v1154_v44 = vld [vmem:[#allocation6] sm:$0xff] }
 0x32f   :  { %v834_v59 = vpop.xlane.xlu0 %833  ;;  %v831_v0 = vpop.xlane.xlu1 %830 }
 0x330   :  { %1644 = vpow2.f32 %v853_v54  ;;  %v842_v2 = vsub.f32 %v2171_v10, %v834_v59  ;;  %v841_v50 = vsub.f32 %v2135_v63, %v831_v0  ;;  %v1157_v0 = vld [vmem:[#allocation6 + $0x18] sm:$0xff] }
 0x331   :  { %1646 = vpow2.f32 %v851_v57 }
 0x332   :  { %v1637_v38 = vpop.eup %1636  ;;  %v857_v5 = vmul.f32 1.442695, %v842_v2  ;;  %v855_v51 = vmul.f32 1.442695, %v841_v50 }
 0x333   :  { %v1639_v6 = vpop.eup %1638  ;;  %v1123_v7 = vmul.f32 %v1637_v38, %v1900_v18  ;;  %v1156_v38 = vld [vmem:[#allocation6 + $0x10] sm:$0xff] }
 0x334   :  { %1648 = vpow2.f32 %v857_v5  ;;  %v1122_v45 = vmul.f32 %v1639_v6, %v1847_v49 }
 0x335   :  { %1650 = vpow2.f32 %v855_v51  ;;  %v1132_v55 = vsel %vm219_vm1, %v1123_v7, 0.0 }
 0x336   :  { %v1641_v4 = vpop.eup %1640  ;;  %v1131_v60 = vsel %vm219_vm1, %v1122_v45, 0.0  ;;  %v1613_v56 = vpack.c.bf16 %v1123_v7, %v1122_v45 }
 0x337   :  { %v1643_v10 = vpop.eup %1642  ;;  %v1125_v63 = vmul.f32 %v1641_v4, %v1928_v25  ;;  %v1133_v8 = vadd.f32 %v1132_v55, %v1131_v60  ;;  %v1323_v54 = vpop.permute.xlu0 %1322 }
 0x338   :  { %1614 = vmatprep.subr.bf16.mxu0 %v1613_v56  ;;  %v1124_v58 = vmul.f32 %v1643_v10, %v1912_v21 }
 0x339   :  { %1616 = vmatpush3.bf16.msra.mxu0 %v1613_v56  ;;  %v1136_v11 = vsel %vm219_vm1, %v1125_v63, 0.0 }
 0x33a   :  { %v1645_v9 = vpop.eup %1644  ;;  %v1134_v18 = vsel %vm219_vm1, %v1124_v58, 0.0  ;;  %v1617_v61 = vpack.c.bf16 %v1125_v63, %v1124_v58 }
 0x33b   :  { %v1647_v49 = vpop.eup %1646  ;;  %v1135_v48 = vadd.f32 %v1134_v18, %v1133_v8  ;;  %v1127_v52 = vmul.f32 %v1645_v9, %v1959_v33  ;;  %v1328_v59 = vpop.permute.xlu0 %1327 }
 0x33c   :  { %1618 = vmatprep.subr.bf16.mxu0 %v1617_v61  ;;  %v1126_v12 = vmul.f32 %v1647_v49, %v1943_v29 }
 0x33d   :  { %v1137_v53 = vadd.f32 %v1136_v11, %v1135_v48  ;;  %1620 = vmatpush3.bf16.msra.mxu0 %v1617_v61  ;;  %v1140_v17 = vsel %vm219_vm1, %v1127_v52, 0.0 }
 0x33e   :  { %v1649_v25 = vpop.eup %1648  ;;  %v1138_v21 = vsel %vm219_vm1, %v1126_v12, 0.0  ;;  %v1621_v13 = vpack.c.bf16 %v1127_v52, %v1126_v12 }
 0x33f   :  { %v1651_v14 = vpop.eup %1650  ;;  %v1139_v15 = vadd.f32 %v1138_v21, %v1137_v53  ;;  %v1129_v16 = vmul.f32 %v1649_v25, %v1984_v37  ;;  %v1333_v55 = vpop.permute.xlu0 %1332 }
 0x340   :  { %1622 = vmatprep.subr.bf16.mxu0 %v1621_v13  ;;  %v1128_v33 = vmul.f32 %v1651_v14, %v1968_v34 }
 0x341   :  { %v1141_v1 = vadd.f32 %v1140_v17, %v1139_v15  ;;  %1624 = vmatpush3.bf16.msra.mxu0 %v1621_v13  ;;  %v1144_v22 = vsel %vm219_vm1, %v1129_v16, 0.0 }
 0x342   :  { %v1142_v19 = vsel %vm219_vm1, %v1128_v33, 0.0  ;;  %v1625_v29 = vpack.c.bf16 %v1129_v16, %v1128_v33 }
 0x343   :  { %v1143_v20 = vadd.f32 %v1142_v19, %v1141_v1  ;;  %v1338_v18 = vpop.permute.xlu0 %1337 }
 0x344   :  { %1626 = vmatprep.subr.bf16.mxu0 %v1625_v29 }
 0x345   :  { %v1145_v23 = vadd.f32 %v1144_v22, %v1143_v20  ;;  %1628 = vmatpush3.bf16.msra.mxu0 %v1625_v29 }
 0x347   :  { %v1146_v47 = vrot.slane %v1145_v23, 4 }
 0x349   :  { %v1147_v62 = vadd.f32 %v1146_v47, %v1145_v23 }
 0x34b   :  { %v1148_v41 = vrot.slane %v1147_v62, 2 }
 0x34d   :  { %v1149_v37 = vadd.f32 %v1148_v41, %v1147_v62 }
 0x34f   :  { %v1150_v24 = vrot.slane %v1149_v37, 1 }
 0x351   :  { %v1151_v28 = vadd.f32 %v1150_v24, %v1149_v37 }
 0x353   :  { %v1152_v43 = vadd.f32 %v1151_v28, %v1130_v30 }
 0x355   :  { %1153 = vst.msk [vmem:[#allocation5] sm:$0x1] %vm2279_vm9, %v1152_v43  ;;  %v1174_v34 = vpop.trf.xlu1 }
 0x356   :  { %1551 = vmatprep.mubr.msk.f32.mxu0 %vm1190_vm8, %v1174_v34 }
 0x359   :  { %v1175_v3 = vpop.trf.xlu1 }
 0x35a   :  { %1552 = vmatmul.mubr.msk.f32.vlgmr.msra.gmra.mrb[20].mxu0 %vm1190_vm8, %v1175_v3 }
 0x35c   :  { %v1303_v27 = vld [vmem:[#allocation5] sm:$0x1] }
 0x35d   :  { %v1176_v31 = vpop.trf.xlu1  ;;  %v1304_v35 = vadd.f32 1e-16, %v1303_v27 }
 0x35e   :  { %1554 = vmatprep.mubr.msk.f32.mxu0 %vm1190_vm8, %v1176_v31 }
 0x35f   :  { %v1309_v46 = vrot.slane %v1304_v35, %v2182_v26 }
 0x361   :  { %v1177_v32 = vpop.trf.xlu1  ;;  %1652 = vrcp.f32 %v1309_v46 }
 0x362   :  { %1555 = vmatmul.mubr.msk.f32.gmra.mrb[22].mxu0 %vm1190_vm8, %v1177_v32 }
 0x36b   :  { %v1653_v51 = vpop.eup %1652 }
 0x42d   :  { %v1553_v40 = vpop.f32.mrb[20].mxu0 }
 0x42e   :  { %v1289_v42 = vadd.f32 %v1553_v40, %v1155_v39  ;;  %v1269_v36 = vpop.f32.mrb[21].mxu0 }
 0x42f   :  { %v1288_v57 = vadd.f32 %v1269_v36, %v1154_v44 }
 0x430   :  { %1293 = vst.msk [vmem:[#allocation6 + $0x8] sm:$0xff] %vm219_vm1, %v1289_v42 }
 0x431   :  { %1292 = vst.msk [vmem:[#allocation6] sm:$0xff] %vm219_vm1, %v1288_v57 }
 0x435   :  { %v1556_v2 = vpop.f32.mrb[22].mxu0 }
 0x436   :  { %v1291_v50 = vadd.f32 %v1556_v2, %v1157_v0  ;;  %v1279_v5 = vpop.f32.mrb[23].mxu0 }
 0x437   :  { %v1300_v26 = vld [vmem:[#allocation6 + $0x8] sm:$0xff]  ;;  %v1290_v6 = vadd.f32 %v1279_v5, %v1156_v38 }
 0x438   :  { %v1313_v7 = vmul.f32 %v1653_v51, %v1300_v26  ;;  %v1299_v45 = vld [vmem:[#allocation6] sm:$0xff]  ;;  %1295 = vst.msk [vmem:[#allocation6 + $0x18] sm:$0xff] %vm219_vm1, %v1291_v50 }
 0x439   :  { %v1312_v4 = vmul.f32 %v1653_v51, %v1299_v45  ;;  %1294 = vst.msk [vmem:[#allocation6 + $0x10] sm:$0xff] %vm219_vm1, %v1290_v6 }
 0x43a   :  { %v1341_v60 = vadd.f32 %v1328_v59, %v1313_v7 }
 0x43b   :  { %v1340_v56 = vadd.f32 %v1323_v54, %v1312_v4 }
 0x43c   :  { %v1345_v10 = vmax.f32 %v1341_v60, 0.0 }
 0x43d   :  { %v1344_v63 = vmax.f32 %v1340_v56, 0.0 }
 0x43e   :  { %1349 = vst.msk [vmem:[%s2275_s9 + $0x8] sm:$0xff] %vm219_vm1, %v1345_v10 }
 0x43f   :  { %1348 = vst.msk [vmem:[%s2275_s9] sm:$0xff] %vm219_vm1, %v1344_v63  ;;  %v1302_v58 = vld [vmem:[#allocation6 + $0x18] sm:$0xff] }
 0x440   :  { %v1315_v8 = vmul.f32 %v1653_v51, %v1302_v58  ;;  %v1301_v9 = vld [vmem:[#allocation6 + $0x10] sm:$0xff] }
 0x441   :  { %v1314_v61 = vmul.f32 %v1653_v51, %v1301_v9 }
 0x442   :  { %v1343_v49 = vadd.f32 %v1338_v18, %v1315_v8 }
 0x443   :  { %v1342_v48 = vadd.f32 %v1333_v55, %v1314_v61 }
 0x444   :  { %v1347_v52 = vmax.f32 %v1343_v49, 0.0 }
 0x445   :  { %v1346_v11 = vmax.f32 %v1342_v48, 0.0 }
 0x446   :  { %1351 = vst.msk [vmem:[%s2275_s9 + $0x18] sm:$0xff] %vm219_vm1, %v1347_v52 }
 0x447   :  { %1350 = vst.msk [vmem:[%s2275_s9 + $0x10] sm:$0xff] %vm219_vm1, %v1346_v11 }

</bundles_post_ra>
